<compile_context>
chip_gen: v7x
topology: tpu7x:2x2x1
jax: 0.10.0
libtpu: 0.0.40
codegen_flags: <defaults>
</compile_context>

<pallas_src>
import numpy as np
import jax
import jax.numpy as jnp
from jax.experimental import pallas as pl
from jax.experimental.pallas import tpu as pltpu


# ----------------------------------------------------------------------------
# Fused Pallas kernel: conv1 -> conv2 -> conv3 -> adaptive-pool -> fc
# ----------------------------------------------------------------------------
def _student_kernel(cols1_ref, w1_ref, b1_ref,
                    s2_ref, w2_ref, b2_ref,
                    s3_ref, w3_ref, b3_ref,
                    p_ref, wfc_ref, bfc_ref,
                    o_ref):
    f32, bf16 = jnp.float32, jnp.bfloat16

    # ---- conv1 (pre-extracted patches): (M1,K1)@(K1,128), bias+ReLU in f32 --
    x1 = cols1_ref[0]                                            # (M1, K1) f32
    a = jnp.dot(x1.astype(bf16), w1_ref[...], preferred_element_type=f32)
    a = jnp.maximum(a + b1_ref[...], 0.0)                        # (M1, 128) f32

    # ---- conv2 / conv3: per-offset row-selection matmul + weight matmul ----
    def conv_block(a_in, s_ref, w_ref, b_ref):
        acc = None
        for k in range(s_ref.shape[0]):                          # kh*kw offsets
            g = jnp.dot(s_ref[k], a_in, preferred_element_type=f32)  # gather rows
            t = jnp.dot(g.astype(bf16), w_ref[k], preferred_element_type=f32)
            acc = t if acc is None else acc + t
        return jnp.maximum(acc + b_ref[...], 0.0)

    a = conv_block(a, s2_ref, w2_ref, b2_ref)                    # (M2, 128)
    a = conv_block(a, s3_ref, w3_ref, b3_ref)                    # (M3, 128)

    # ---- adaptive avg-pool(2x2) + flatten + fc, fused as 4 matmul pairs ----
    acc = None
    for q in range(p_ref.shape[0]):                              # 4 pooled cells
        pooled = jnp.dot(p_ref[q], a, preferred_element_type=f32)      # (1, 128)
        t = jnp.dot(pooled.astype(bf16), wfc_ref[q], preferred_element_type=f32)
        acc = t if acc is None else acc + t                      # (1, 10)
    o_ref[0] = acc + bfc_ref[...]


# ----------------------------------------------------------------------------
# Trace-time helpers (tiny boundary glue / constant selector construction)
# ----------------------------------------------------------------------------
def _im2col(x, kh, kw, stride):
    """NCHW -> (B, Ho*Wo, Cin*kh*kw) patches, PyTorch (ci, i, j) column order."""
    B, C, H, W = x.shape
    Ho = (H - kh) // stride + 1
    Wo = (W - kw) // stride + 1
    patches = []
    for i in range(kh):
        for j in range(kw):
            patches.append(
                x[:, :, i:i + Ho * stride:stride, j:j + Wo * stride:stride])
    p = jnp.stack(patches, axis=0).reshape(kh, kw, B, C, Ho, Wo)
    p = jnp.transpose(p, (2, 4, 5, 3, 0, 1))          # (B, Ho, Wo, C, kh, kw)
    return p.reshape(B, Ho * Wo, C * kh * kw), Ho, Wo


def _conv_selectors(hi, wi, kh, kw, stride):
    """0/1 row-selection matrices, one per kernel offset: (kh*kw, Ho*Wo, Hi*Wi)."""
    ho = (hi - kh) // stride + 1
    wo = (wi - kw) // stride + 1
    s = np.zeros((kh * kw, ho * wo, hi * wi), np.float32)
    for i in range(kh):
        for j in range(kw):
            k = i * kw + j
            for oh in range(ho):
                for ow in range(wo):
                    s[k, oh * wo + ow,
                      (stride * oh + i) * wi + (stride * ow + j)] = 1.0
    return s, ho, wo


def _pool_selectors(hc, wc, out=2):
    """AdaptiveAvgPool2d(out) as averaging row-mix matrices: (out*out, 1, Hc*Wc)."""
    p = np.zeros((out * out, 1, hc * wc), np.float32)
    for oh in range(out):
        hs, he = (oh * hc) // out, -(-((oh + 1) * hc) // out)
        for ow in range(out):
            ws, we = (ow * wc) // out, -(-((ow + 1) * wc) // out)
            inv = 1.0 / float((he - hs) * (we - ws))
            for h in range(hs, he):
                for w in range(ws, we):
                    p[oh * out + ow, 0, h * wc + w] = inv
    return p


# ----------------------------------------------------------------------------
# Student forward pass (single pallas_call)
# ----------------------------------------------------------------------------
@jax.jit
def student_forward(params, x):
    B = x.shape[0]
    f32, bf16 = jnp.float32, jnp.bfloat16

    # Boundary glue: patch-extract the (tiny) raw input for conv1.
    cols1, ho1, wo1 = _im2col(x.astype(f32), 3, 3, 2)            # (B, M1, 27)
    m1, k1 = cols1.shape[1], cols1.shape[2]

    # Static per-offset selection matrices (numpy constants at trace time).
    s2, ho2, wo2 = _conv_selectors(ho1, wo1, 3, 3, 2)
    s3, ho3, wo3 = _conv_selectors(ho2, wo2, 2, 2, 1)
    pool = _pool_selectors(ho3, wo3, 2)
    m2, m3 = ho2 * wo2, ho3 * wo3

    # Weight prep: lane-dense (Cin, Cout) per kernel offset; bf16 for the MXU.
    w1m = params["w1"].reshape(128, -1).T.astype(bf16)                      # (27, 128)
    w2m = jnp.transpose(params["w2"], (2, 3, 1, 0)).reshape(9, 128, 128).astype(bf16)
    w3m = jnp.transpose(params["w3"], (2, 3, 1, 0)).reshape(4, 128, 128).astype(bf16)
    # PyTorch flattens pooled NCHW (128,2,2) as c*4+q; stored w_fc is (512, 10).
    wfcm = jnp.transpose(params["w_fc"].reshape(128, 4, 10), (1, 0, 2)).astype(bf16)
    b1m = params["b1"].reshape(1, -1).astype(f32)
    b2m = params["b2"].reshape(1, -1).astype(f32)
    b3m = params["b3"].reshape(1, -1).astype(f32)
    bfcm = params["b_fc"].reshape(1, -1).astype(f32)

    out = pl.pallas_call(
        _student_kernel,
        out_shape=jax.ShapeDtypeStruct((B, 1, 10), f32),
        grid=(B,),
        in_specs=[
            pl.BlockSpec((1, m1, k1), lambda b: (b, 0, 0)),       # per-sample patches
            pl.BlockSpec((k1, 128), lambda b: (0, 0)),            # conv1 weight
            pl.BlockSpec((1, 128), lambda b: (0, 0)),             # conv1 bias
            pl.BlockSpec((9, m2, m1), lambda b: (0, 0, 0)),       # conv2 selectors
            pl.BlockSpec((9, 128, 128), lambda b: (0, 0, 0)),     # conv2 weights
            pl.BlockSpec((1, 128), lambda b: (0, 0)),             # conv2 bias
            pl.BlockSpec((4, m3, m2), lambda b: (0, 0, 0)),       # conv3 selectors
            pl.BlockSpec((4, 128, 128), lambda b: (0, 0, 0)),     # conv3 weights
            pl.BlockSpec((1, 128), lambda b: (0, 0)),             # conv3 bias
            pl.BlockSpec((4, 1, m3), lambda b: (0, 0, 0)),        # pool selectors
            pl.BlockSpec((4, 128, 10), lambda b: (0, 0, 0)),      # fc weight per cell
            pl.BlockSpec((1, 10), lambda b: (0, 0)),              # fc bias
        ],
        out_specs=pl.BlockSpec((1, 1, 10), lambda b: (b, 0, 0)),
        compiler_params=pltpu.CompilerParams(
            dimension_semantics=("parallel",)),
    )(cols1, w1m, b1m, jnp.asarray(s2), w2m, b2m,
      jnp.asarray(s3), w3m, b3m, jnp.asarray(pool), wfcm, bfcm)
    return out[:, 0, :]                                           # (B, 10)


# ----------------------------------------------------------------------------
# Pure-JAX reference (for correctness check)
# ----------------------------------------------------------------------------
def _adaptive_avg_pool2d_ref(x, out_size=2):
    B, C, H, W = x.shape
    rows = []
    for i in range(out_size):
        hs, he = (i * H) // out_size, -(-((i + 1) * H) // out_size)
        cols = []
        for j in range(out_size):
            ws, we = (j * W) // out_size, -(-((j + 1) * W) // out_size)
            cols.append(jnp.mean(x[:, :, hs:he, ws:we], axis=(2, 3)))
        rows.append(jnp.stack(cols, axis=-1))
    return jnp.stack(rows, axis=-2)                               # (B, C, 2, 2)


def _ref_conv(x, w, b, stride):
    y = jax.lax.conv_general_dilated(
        x, w, (stride, stride), "VALID",
        dimension_numbers=("NCHW", "OIHW", "NCHW"),
        precision=jax.lax.Precision.HIGHEST)
    return y + b[None, :, None, None]


def reference_forward(params, x):
    out = jnp.maximum(_ref_conv(x, params["w1"], params["b1"], 2), 0.0)
    out = jnp.maximum(_ref_conv(out, params["w2"], params["b2"], 2), 0.0)
    out = jnp.maximum(_ref_conv(out, params["w3"], params["b3"], 1), 0.0)
    out = _adaptive_avg_pool2d_ref(out, 2).reshape(x.shape[0], -1)
    return out @ params["w_fc"] + params["b_fc"]


# ----------------------------------------------------------------------------
def init_params(key):
    ks = jax.random.split(key, 8)

    def uconv(k, shape):
        fan_in = shape[1] * shape[2] * shape[3]
        bound = 1.0 / jnp.sqrt(fan_in)
        return jax.random.uniform(k, shape, jnp.float32, -bound, bound)

    def uvec(k, n, fan_in):
        bound = 1.0 / jnp.sqrt(fan_in)
        return jax.random.uniform(k, (n,), jnp.float32, -bound, bound)

    return {
        "w1": uconv(ks[0], (128, 3, 3, 3)),   "b1": uvec(ks[1], 128, 3 * 9),
        "w2": uconv(ks[2], (128, 128, 3, 3)), "b2": uvec(ks[3], 128, 128 * 9),
        "w3": uconv(ks[4], (128, 128, 2, 2)), "b3": uvec(ks[5], 128, 128 * 4),
        # stored as (512, 10) = PyTorch Linear weight (10, 512) transposed
        "w_fc": jax.random.uniform(ks[6], (512, 10), jnp.float32,
                                   -1.0 / jnp.sqrt(512.0), 1.0 / jnp.sqrt(512.0)),
        "b_fc": uvec(ks[7], 10, 512),
    }


if __name__ == "__main__":
    key = jax.random.PRNGKey(0)
    kp, kx = jax.random.split(key)
    params = init_params(kp)

    # Input consistent with the module: 3 input channels, spatial 16.
    # 16 -> conv(3,s2) 7 -> conv(3,s2) 3 -> conv(2,s1) 2 -> pool 2x2 -> 512 -> 10
    x = jax.random.normal(kx, (2, 3, 16, 16), jnp.float32)

    out = student_forward(params, x)
    out = jax.block_until_ready(out)
    assert out.shape == (2, 10), out.shape

    ref = reference_forward(params, x)
    assert jnp.allclose(out, ref, rtol=5e-2, atol=5e-2), (
        "mismatch vs reference", float(jnp.max(jnp.abs(out - ref))))

    print("KERNEL_OK")
</pallas_src>

<mosaic_0001>
module attributes {stable_mosaic.version = 11 : i64} {
  func.func @_student_kernel(%arg0: i32, %arg1: memref<1x49x27xf32, #tpu.memory_space<vmem>>, %arg2: memref<27x128xbf16, #tpu.memory_space<vmem>>, %arg3: memref<1x128xf32, #tpu.memory_space<vmem>>, %arg4: memref<9x9x49xf32, #tpu.memory_space<vmem>>, %arg5: memref<9x128x128xbf16, #tpu.memory_space<vmem>>, %arg6: memref<1x128xf32, #tpu.memory_space<vmem>>, %arg7: memref<4x4x9xf32, #tpu.memory_space<vmem>>, %arg8: memref<4x128x128xbf16, #tpu.memory_space<vmem>>, %arg9: memref<1x128xf32, #tpu.memory_space<vmem>>, %arg10: memref<4x1x4xf32, #tpu.memory_space<vmem>>, %arg11: memref<4x128x10xbf16, #tpu.memory_space<vmem>>, %arg12: memref<1x10xf32, #tpu.memory_space<vmem>>, %arg13: memref<1x1x10xf32, #tpu.memory_space<vmem>>) attributes {dimension_semantics = [#tpu.dimension_semantics<parallel>], iteration_bounds = array<i64: 2>, scalar_prefetch = 0 : i64, scratch_operands = 0 : i64, tpu.core_type = #tpu.core_type<tc>, window_params = [{transform_indices = @transform_0, window_bounds = array<i64: 1, 49, 27>}, {pipeline_mode = #tpu.pipeline_mode<synchronous>, transform_indices = @transform_1, window_bounds = array<i64: 27, 128>}, {pipeline_mode = #tpu.pipeline_mode<synchronous>, transform_indices = @transform_2, window_bounds = array<i64: 1, 128>}, {pipeline_mode = #tpu.pipeline_mode<synchronous>, transform_indices = @transform_3, window_bounds = array<i64: 9, 9, 49>}, {pipeline_mode = #tpu.pipeline_mode<synchronous>, transform_indices = @transform_4, window_bounds = array<i64: 9, 128, 128>}, {pipeline_mode = #tpu.pipeline_mode<synchronous>, transform_indices = @transform_5, window_bounds = array<i64: 1, 128>}, {pipeline_mode = #tpu.pipeline_mode<synchronous>, transform_indices = @transform_6, window_bounds = array<i64: 4, 4, 9>}, {pipeline_mode = #tpu.pipeline_mode<synchronous>, transform_indices = @transform_7, window_bounds = array<i64: 4, 128, 128>}, {pipeline_mode = #tpu.pipeline_mode<synchronous>, transform_indices = @transform_8, window_bounds = array<i64: 1, 128>}, {pipeline_mode = #tpu.pipeline_mode<synchronous>, transform_indices = @transform_9, window_bounds = array<i64: 4, 1, 4>}, {pipeline_mode = #tpu.pipeline_mode<synchronous>, transform_indices = @transform_10, window_bounds = array<i64: 4, 128, 10>}, {pipeline_mode = #tpu.pipeline_mode<synchronous>, transform_indices = @transform_11, window_bounds = array<i64: 1, 10>}, {transform_indices = @transform_12, window_bounds = array<i64: 1, 1, 10>}]} {
    %c0 = arith.constant 0 : index
    %c0_0 = arith.constant 0 : index
    %c0_1 = arith.constant 0 : index
    %0 = vector.load %arg1[%c0, %c0_0, %c0_1] : memref<1x49x27xf32, #tpu.memory_space<vmem>>, vector<1x49x27xf32>
    %1 = vector.shape_cast %0 : vector<1x49x27xf32> to vector<49x27xf32>
    %2 = arith.truncf %1 : vector<49x27xf32> to vector<49x27xbf16>
    %c0_2 = arith.constant 0 : index
    %c0_3 = arith.constant 0 : index
    %3 = vector.load %arg2[%c0_2, %c0_3] : memref<27x128xbf16, #tpu.memory_space<vmem>>, vector<27x128xbf16>
    %cst = arith.constant dense<0.000000e+00> : vector<49x128xf32>
    %4 = tpu.matmul %2, %3, %cst {dimension_numbers = #tpu.dot_dimension_numbers<[1], [0], [0], [1], [0, 0, 1, 1], [], []>} : vector<49x27xbf16>, vector<27x128xbf16>, vector<49x128xf32> -> vector<49x128xf32>
    %c0_4 = arith.constant 0 : index
    %c0_5 = arith.constant 0 : index
    %5 = vector.load %arg3[%c0_4, %c0_5] : memref<1x128xf32, #tpu.memory_space<vmem>>, vector<1x128xf32>
    %6 = vector.broadcast %5 : vector<1x128xf32> to vector<49x128xf32>
    %7 = arith.addf %4, %6 : vector<49x128xf32>
    %cst_6 = arith.constant 0.000000e+00 : f32
    %8 = vector.broadcast %cst_6 : f32 to vector<49x128xf32>
    %9 = arith.maximumf %7, %8 : vector<49x128xf32>
    %c0_7 = arith.constant 0 : index
    %c0_8 = arith.constant 0 : index
    %c0_9 = arith.constant 0 : index
    %10 = vector.load %arg4[%c0_7, %c0_8, %c0_9] : memref<9x9x49xf32, #tpu.memory_space<vmem>>, vector<1x9x49xf32>
    %11 = vector.shape_cast %10 : vector<1x9x49xf32> to vector<9x49xf32>
    %cst_10 = arith.constant dense<0.000000e+00> : vector<9x128xf32>
    %12 = tpu.matmul %11, %9, %cst_10 {dimension_numbers = #tpu.dot_dimension_numbers<[1], [0], [0], [1], [0, 0, 1, 1], [], []>} : vector<9x49xf32>, vector<49x128xf32>, vector<9x128xf32> -> vector<9x128xf32>
    %13 = arith.truncf %12 : vector<9x128xf32> to vector<9x128xbf16>
    %c0_11 = arith.constant 0 : index
    %c0_12 = arith.constant 0 : index
    %c0_13 = arith.constant 0 : index
    %14 = vector.load %arg5[%c0_11, %c0_12, %c0_13] : memref<9x128x128xbf16, #tpu.memory_space<vmem>>, vector<1x128x128xbf16>
    %15 = vector.shape_cast %14 : vector<1x128x128xbf16> to vector<128x128xbf16>
    %cst_14 = arith.constant dense<0.000000e+00> : vector<9x128xf32>
    %16 = tpu.matmul %13, %15, %cst_14 {dimension_numbers = #tpu.dot_dimension_numbers<[1], [0], [0], [1], [0, 0, 1, 1], [], []>} : vector<9x128xbf16>, vector<128x128xbf16>, vector<9x128xf32> -> vector<9x128xf32>
    %c1 = arith.constant 1 : index
    %c0_15 = arith.constant 0 : index
    %c0_16 = arith.constant 0 : index
    %17 = vector.load %arg4[%c1, %c0_15, %c0_16] : memref<9x9x49xf32, #tpu.memory_space<vmem>>, vector<1x9x49xf32>
    %18 = vector.shape_cast %17 : vector<1x9x49xf32> to vector<9x49xf32>
    %cst_17 = arith.constant dense<0.000000e+00> : vector<9x128xf32>
    %19 = tpu.matmul %18, %9, %cst_17 {dimension_numbers = #tpu.dot_dimension_numbers<[1], [0], [0], [1], [0, 0, 1, 1], [], []>} : vector<9x49xf32>, vector<49x128xf32>, vector<9x128xf32> -> vector<9x128xf32>
    %20 = arith.truncf %19 : vector<9x128xf32> to vector<9x128xbf16>
    %c1_18 = arith.constant 1 : index
    %c0_19 = arith.constant 0 : index
    %c0_20 = arith.constant 0 : index
    %21 = vector.load %arg5[%c1_18, %c0_19, %c0_20] : memref<9x128x128xbf16, #tpu.memory_space<vmem>>, vector<1x128x128xbf16>
    %22 = vector.shape_cast %21 : vector<1x128x128xbf16> to vector<128x128xbf16>
    %cst_21 = arith.constant dense<0.000000e+00> : vector<9x128xf32>
    %23 = tpu.matmul %20, %22, %cst_21 {dimension_numbers = #tpu.dot_dimension_numbers<[1], [0], [0], [1], [0, 0, 1, 1], [], []>} : vector<9x128xbf16>, vector<128x128xbf16>, vector<9x128xf32> -> vector<9x128xf32>
    %24 = arith.addf %16, %23 : vector<9x128xf32>
    %c2 = arith.constant 2 : index
    %c0_22 = arith.constant 0 : index
    %c0_23 = arith.constant 0 : index
    %25 = vector.load %arg4[%c2, %c0_22, %c0_23] : memref<9x9x49xf32, #tpu.memory_space<vmem>>, vector<1x9x49xf32>
    %26 = vector.shape_cast %25 : vector<1x9x49xf32> to vector<9x49xf32>
    %cst_24 = arith.constant dense<0.000000e+00> : vector<9x128xf32>
    %27 = tpu.matmul %26, %9, %cst_24 {dimension_numbers = #tpu.dot_dimension_numbers<[1], [0], [0], [1], [0, 0, 1, 1], [], []>} : vector<9x49xf32>, vector<49x128xf32>, vector<9x128xf32> -> vector<9x128xf32>
    %28 = arith.truncf %27 : vector<9x128xf32> to vector<9x128xbf16>
    %c2_25 = arith.constant 2 : index
    %c0_26 = arith.constant 0 : index
    %c0_27 = arith.constant 0 : index
    %29 = vector.load %arg5[%c2_25, %c0_26, %c0_27] : memref<9x128x128xbf16, #tpu.memory_space<vmem>>, vector<1x128x128xbf16>
    %30 = vector.shape_cast %29 : vector<1x128x128xbf16> to vector<128x128xbf16>
    %cst_28 = arith.constant dense<0.000000e+00> : vector<9x128xf32>
    %31 = tpu.matmul %28, %30, %cst_28 {dimension_numbers = #tpu.dot_dimension_numbers<[1], [0], [0], [1], [0, 0, 1, 1], [], []>} : vector<9x128xbf16>, vector<128x128xbf16>, vector<9x128xf32> -> vector<9x128xf32>
    %32 = arith.addf %24, %31 : vector<9x128xf32>
    %c3 = arith.constant 3 : index
    %c0_29 = arith.constant 0 : index
    %c0_30 = arith.constant 0 : index
    %33 = vector.load %arg4[%c3, %c0_29, %c0_30] : memref<9x9x49xf32, #tpu.memory_space<vmem>>, vector<1x9x49xf32>
    %34 = vector.shape_cast %33 : vector<1x9x49xf32> to vector<9x49xf32>
    %cst_31 = arith.constant dense<0.000000e+00> : vector<9x128xf32>
    %35 = tpu.matmul %34, %9, %cst_31 {dimension_numbers = #tpu.dot_dimension_numbers<[1], [0], [0], [1], [0, 0, 1, 1], [], []>} : vector<9x49xf32>, vector<49x128xf32>, vector<9x128xf32> -> vector<9x128xf32>
    %36 = arith.truncf %35 : vector<9x128xf32> to vector<9x128xbf16>
    %c3_32 = arith.constant 3 : index
    %c0_33 = arith.constant 0 : index
    %c0_34 = arith.constant 0 : index
    %37 = vector.load %arg5[%c3_32, %c0_33, %c0_34] : memref<9x128x128xbf16, #tpu.memory_space<vmem>>, vector<1x128x128xbf16>
    %38 = vector.shape_cast %37 : vector<1x128x128xbf16> to vector<128x128xbf16>
    %cst_35 = arith.constant dense<0.000000e+00> : vector<9x128xf32>
    %39 = tpu.matmul %36, %38, %cst_35 {dimension_numbers = #tpu.dot_dimension_numbers<[1], [0], [0], [1], [0, 0, 1, 1], [], []>} : vector<9x128xbf16>, vector<128x128xbf16>, vector<9x128xf32> -> vector<9x128xf32>
    %40 = arith.addf %32, %39 : vector<9x128xf32>
    %c4 = arith.constant 4 : index
    %c0_36 = arith.constant 0 : index
    %c0_37 = arith.constant 0 : index
    %41 = vector.load %arg4[%c4, %c0_36, %c0_37] : memref<9x9x49xf32, #tpu.memory_space<vmem>>, vector<1x9x49xf32>
    %42 = vector.shape_cast %41 : vector<1x9x49xf32> to vector<9x49xf32>
    %cst_38 = arith.constant dense<0.000000e+00> : vector<9x128xf32>
    %43 = tpu.matmul %42, %9, %cst_38 {dimension_numbers = #tpu.dot_dimension_numbers<[1], [0], [0], [1], [0, 0, 1, 1], [], []>} : vector<9x49xf32>, vector<49x128xf32>, vector<9x128xf32> -> vector<9x128xf32>
    %44 = arith.truncf %43 : vector<9x128xf32> to vector<9x128xbf16>
    %c4_39 = arith.constant 4 : index
    %c0_40 = arith.constant 0 : index
    %c0_41 = arith.constant 0 : index
    %45 = vector.load %arg5[%c4_39, %c0_40, %c0_41] : memref<9x128x128xbf16, #tpu.memory_space<vmem>>, vector<1x128x128xbf16>
    %46 = vector.shape_cast %45 : vector<1x128x128xbf16> to vector<128x128xbf16>
    %cst_42 = arith.constant dense<0.000000e+00> : vector<9x128xf32>
    %47 = tpu.matmul %44, %46, %cst_42 {dimension_numbers = #tpu.dot_dimension_numbers<[1], [0], [0], [1], [0, 0, 1, 1], [], []>} : vector<9x128xbf16>, vector<128x128xbf16>, vector<9x128xf32> -> vector<9x128xf32>
    %48 = arith.addf %40, %47 : vector<9x128xf32>
    %c5 = arith.constant 5 : index
    %c0_43 = arith.constant 0 : index
    %c0_44 = arith.constant 0 : index
    %49 = vector.load %arg4[%c5, %c0_43, %c0_44] : memref<9x9x49xf32, #tpu.memory_space<vmem>>, vector<1x9x49xf32>
    %50 = vector.shape_cast %49 : vector<1x9x49xf32> to vector<9x49xf32>
    %cst_45 = arith.constant dense<0.000000e+00> : vector<9x128xf32>
    %51 = tpu.matmul %50, %9, %cst_45 {dimension_numbers = #tpu.dot_dimension_numbers<[1], [0], [0], [1], [0, 0, 1, 1], [], []>} : vector<9x49xf32>, vector<49x128xf32>, vector<9x128xf32> -> vector<9x128xf32>
    %52 = arith.truncf %51 : vector<9x128xf32> to vector<9x128xbf16>
    %c5_46 = arith.constant 5 : index
    %c0_47 = arith.constant 0 : index
    %c0_48 = arith.constant 0 : index
    %53 = vector.load %arg5[%c5_46, %c0_47, %c0_48] : memref<9x128x128xbf16, #tpu.memory_space<vmem>>, vector<1x128x128xbf16>
    %54 = vector.shape_cast %53 : vector<1x128x128xbf16> to vector<128x128xbf16>
    %cst_49 = arith.constant dense<0.000000e+00> : vector<9x128xf32>
    %55 = tpu.matmul %52, %54, %cst_49 {dimension_numbers = #tpu.dot_dimension_numbers<[1], [0], [0], [1], [0, 0, 1, 1], [], []>} : vector<9x128xbf16>, vector<128x128xbf16>, vector<9x128xf32> -> vector<9x128xf32>
    %56 = arith.addf %48, %55 : vector<9x128xf32>
    %c6 = arith.constant 6 : index
    %c0_50 = arith.constant 0 : index
    %c0_51 = arith.constant 0 : index
    %57 = vector.load %arg4[%c6, %c0_50, %c0_51] : memref<9x9x49xf32, #tpu.memory_space<vmem>>, vector<1x9x49xf32>
    %58 = vector.shape_cast %57 : vector<1x9x49xf32> to vector<9x49xf32>
    %cst_52 = arith.constant dense<0.000000e+00> : vector<9x128xf32>
    %59 = tpu.matmul %58, %9, %cst_52 {dimension_numbers = #tpu.dot_dimension_numbers<[1], [0], [0], [1], [0, 0, 1, 1], [], []>} : vector<9x49xf32>, vector<49x128xf32>, vector<9x128xf32> -> vector<9x128xf32>
    %60 = arith.truncf %59 : vector<9x128xf32> to vector<9x128xbf16>
    %c6_53 = arith.constant 6 : index
    %c0_54 = arith.constant 0 : index
    %c0_55 = arith.constant 0 : index
    %61 = vector.load %arg5[%c6_53, %c0_54, %c0_55] : memref<9x128x128xbf16, #tpu.memory_space<vmem>>, vector<1x128x128xbf16>
    %62 = vector.shape_cast %61 : vector<1x128x128xbf16> to vector<128x128xbf16>
    %cst_56 = arith.constant dense<0.000000e+00> : vector<9x128xf32>
    %63 = tpu.matmul %60, %62, %cst_56 {dimension_numbers = #tpu.dot_dimension_numbers<[1], [0], [0], [1], [0, 0, 1, 1], [], []>} : vector<9x128xbf16>, vector<128x128xbf16>, vector<9x128xf32> -> vector<9x128xf32>
    %64 = arith.addf %56, %63 : vector<9x128xf32>
    %c7 = arith.constant 7 : index
    %c0_57 = arith.constant 0 : index
    %c0_58 = arith.constant 0 : index
    %65 = vector.load %arg4[%c7, %c0_57, %c0_58] : memref<9x9x49xf32, #tpu.memory_space<vmem>>, vector<1x9x49xf32>
    %66 = vector.shape_cast %65 : vector<1x9x49xf32> to vector<9x49xf32>
    %cst_59 = arith.constant dense<0.000000e+00> : vector<9x128xf32>
    %67 = tpu.matmul %66, %9, %cst_59 {dimension_numbers = #tpu.dot_dimension_numbers<[1], [0], [0], [1], [0, 0, 1, 1], [], []>} : vector<9x49xf32>, vector<49x128xf32>, vector<9x128xf32> -> vector<9x128xf32>
    %68 = arith.truncf %67 : vector<9x128xf32> to vector<9x128xbf16>
    %c7_60 = arith.constant 7 : index
    %c0_61 = arith.constant 0 : index
    %c0_62 = arith.constant 0 : index
    %69 = vector.load %arg5[%c7_60, %c0_61, %c0_62] : memref<9x128x128xbf16, #tpu.memory_space<vmem>>, vector<1x128x128xbf16>
    %70 = vector.shape_cast %69 : vector<1x128x128xbf16> to vector<128x128xbf16>
    %cst_63 = arith.constant dense<0.000000e+00> : vector<9x128xf32>
    %71 = tpu.matmul %68, %70, %cst_63 {dimension_numbers = #tpu.dot_dimension_numbers<[1], [0], [0], [1], [0, 0, 1, 1], [], []>} : vector<9x128xbf16>, vector<128x128xbf16>, vector<9x128xf32> -> vector<9x128xf32>
    %72 = arith.addf %64, %71 : vector<9x128xf32>
    %c8 = arith.constant 8 : index
    %c0_64 = arith.constant 0 : index
    %c0_65 = arith.constant 0 : index
    %73 = vector.load %arg4[%c8, %c0_64, %c0_65] : memref<9x9x49xf32, #tpu.memory_space<vmem>>, vector<1x9x49xf32>
    %74 = vector.shape_cast %73 : vector<1x9x49xf32> to vector<9x49xf32>
    %cst_66 = arith.constant dense<0.000000e+00> : vector<9x128xf32>
    %75 = tpu.matmul %74, %9, %cst_66 {dimension_numbers = #tpu.dot_dimension_numbers<[1], [0], [0], [1], [0, 0, 1, 1], [], []>} : vector<9x49xf32>, vector<49x128xf32>, vector<9x128xf32> -> vector<9x128xf32>
    %76 = arith.truncf %75 : vector<9x128xf32> to vector<9x128xbf16>
    %c8_67 = arith.constant 8 : index
    %c0_68 = arith.constant 0 : index
    %c0_69 = arith.constant 0 : index
    %77 = vector.load %arg5[%c8_67, %c0_68, %c0_69] : memref<9x128x128xbf16, #tpu.memory_space<vmem>>, vector<1x128x128xbf16>
    %78 = vector.shape_cast %77 : vector<1x128x128xbf16> to vector<128x128xbf16>
    %cst_70 = arith.constant dense<0.000000e+00> : vector<9x128xf32>
    %79 = tpu.matmul %76, %78, %cst_70 {dimension_numbers = #tpu.dot_dimension_numbers<[1], [0], [0], [1], [0, 0, 1, 1], [], []>} : vector<9x128xbf16>, vector<128x128xbf16>, vector<9x128xf32> -> vector<9x128xf32>
    %80 = arith.addf %72, %79 : vector<9x128xf32>
    %c0_71 = arith.constant 0 : index
    %c0_72 = arith.constant 0 : index
    %81 = vector.load %arg6[%c0_71, %c0_72] : memref<1x128xf32, #tpu.memory_space<vmem>>, vector<1x128xf32>
    %82 = vector.broadcast %81 : vector<1x128xf32> to vector<9x128xf32>
    %83 = arith.addf %80, %82 : vector<9x128xf32>
    %cst_73 = arith.constant 0.000000e+00 : f32
    %84 = vector.broadcast %cst_73 : f32 to vector<9x128xf32>
    %85 = arith.maximumf %83, %84 : vector<9x128xf32>
    %c0_74 = arith.constant 0 : index
    %c0_75 = arith.constant 0 : index
    %c0_76 = arith.constant 0 : index
    %86 = vector.load %arg7[%c0_74, %c0_75, %c0_76] : memref<4x4x9xf32, #tpu.memory_space<vmem>>, vector<1x4x9xf32>
    %87 = vector.shape_cast %86 : vector<1x4x9xf32> to vector<4x9xf32>
    %cst_77 = arith.constant dense<0.000000e+00> : vector<4x128xf32>
    %88 = tpu.matmul %87, %85, %cst_77 {dimension_numbers = #tpu.dot_dimension_numbers<[1], [0], [0], [1], [0, 0, 1, 1], [], []>} : vector<4x9xf32>, vector<9x128xf32>, vector<4x128xf32> -> vector<4x128xf32>
    %89 = arith.truncf %88 : vector<4x128xf32> to vector<4x128xbf16>
    %c0_78 = arith.constant 0 : index
    %c0_79 = arith.constant 0 : index
    %c0_80 = arith.constant 0 : index
    %90 = vector.load %arg8[%c0_78, %c0_79, %c0_80] : memref<4x128x128xbf16, #tpu.memory_space<vmem>>, vector<1x128x128xbf16>
    %91 = vector.shape_cast %90 : vector<1x128x128xbf16> to vector<128x128xbf16>
    %cst_81 = arith.constant dense<0.000000e+00> : vector<4x128xf32>
    %92 = tpu.matmul %89, %91, %cst_81 {dimension_numbers = #tpu.dot_dimension_numbers<[1], [0], [0], [1], [0, 0, 1, 1], [], []>} : vector<4x128xbf16>, vector<128x128xbf16>, vector<4x128xf32> -> vector<4x128xf32>
    %c1_82 = arith.constant 1 : index
    %c0_83 = arith.constant 0 : index
    %c0_84 = arith.constant 0 : index
    %93 = vector.load %arg7[%c1_82, %c0_83, %c0_84] : memref<4x4x9xf32, #tpu.memory_space<vmem>>, vector<1x4x9xf32>
    %94 = vector.shape_cast %93 : vector<1x4x9xf32> to vector<4x9xf32>
    %cst_85 = arith.constant dense<0.000000e+00> : vector<4x128xf32>
    %95 = tpu.matmul %94, %85, %cst_85 {dimension_numbers = #tpu.dot_dimension_numbers<[1], [0], [0], [1], [0, 0, 1, 1], [], []>} : vector<4x9xf32>, vector<9x128xf32>, vector<4x128xf32> -> vector<4x128xf32>
    %96 = arith.truncf %95 : vector<4x128xf32> to vector<4x128xbf16>
    %c1_86 = arith.constant 1 : index
    %c0_87 = arith.constant 0 : index
    %c0_88 = arith.constant 0 : index
    %97 = vector.load %arg8[%c1_86, %c0_87, %c0_88] : memref<4x128x128xbf16, #tpu.memory_space<vmem>>, vector<1x128x128xbf16>
    %98 = vector.shape_cast %97 : vector<1x128x128xbf16> to vector<128x128xbf16>
    %cst_89 = arith.constant dense<0.000000e+00> : vector<4x128xf32>
    %99 = tpu.matmul %96, %98, %cst_89 {dimension_numbers = #tpu.dot_dimension_numbers<[1], [0], [0], [1], [0, 0, 1, 1], [], []>} : vector<4x128xbf16>, vector<128x128xbf16>, vector<4x128xf32> -> vector<4x128xf32>
    %100 = arith.addf %92, %99 : vector<4x128xf32>
    %c2_90 = arith.constant 2 : index
    %c0_91 = arith.constant 0 : index
    %c0_92 = arith.constant 0 : index
    %101 = vector.load %arg7[%c2_90, %c0_91, %c0_92] : memref<4x4x9xf32, #tpu.memory_space<vmem>>, vector<1x4x9xf32>
    %102 = vector.shape_cast %101 : vector<1x4x9xf32> to vector<4x9xf32>
    %cst_93 = arith.constant dense<0.000000e+00> : vector<4x128xf32>
    %103 = tpu.matmul %102, %85, %cst_93 {dimension_numbers = #tpu.dot_dimension_numbers<[1], [0], [0], [1], [0, 0, 1, 1], [], []>} : vector<4x9xf32>, vector<9x128xf32>, vector<4x128xf32> -> vector<4x128xf32>
    %104 = arith.truncf %103 : vector<4x128xf32> to vector<4x128xbf16>
    %c2_94 = arith.constant 2 : index
    %c0_95 = arith.constant 0 : index
    %c0_96 = arith.constant 0 : index
    %105 = vector.load %arg8[%c2_94, %c0_95, %c0_96] : memref<4x128x128xbf16, #tpu.memory_space<vmem>>, vector<1x128x128xbf16>
    %106 = vector.shape_cast %105 : vector<1x128x128xbf16> to vector<128x128xbf16>
    %cst_97 = arith.constant dense<0.000000e+00> : vector<4x128xf32>
    %107 = tpu.matmul %104, %106, %cst_97 {dimension_numbers = #tpu.dot_dimension_numbers<[1], [0], [0], [1], [0, 0, 1, 1], [], []>} : vector<4x128xbf16>, vector<128x128xbf16>, vector<4x128xf32> -> vector<4x128xf32>
    %108 = arith.addf %100, %107 : vector<4x128xf32>
    %c3_98 = arith.constant 3 : index
    %c0_99 = arith.constant 0 : index
    %c0_100 = arith.constant 0 : index
    %109 = vector.load %arg7[%c3_98, %c0_99, %c0_100] : memref<4x4x9xf32, #tpu.memory_space<vmem>>, vector<1x4x9xf32>
    %110 = vector.shape_cast %109 : vector<1x4x9xf32> to vector<4x9xf32>
    %cst_101 = arith.constant dense<0.000000e+00> : vector<4x128xf32>
    %111 = tpu.matmul %110, %85, %cst_101 {dimension_numbers = #tpu.dot_dimension_numbers<[1], [0], [0], [1], [0, 0, 1, 1], [], []>} : vector<4x9xf32>, vector<9x128xf32>, vector<4x128xf32> -> vector<4x128xf32>
    %112 = arith.truncf %111 : vector<4x128xf32> to vector<4x128xbf16>
    %c3_102 = arith.constant 3 : index
    %c0_103 = arith.constant 0 : index
    %c0_104 = arith.constant 0 : index
    %113 = vector.load %arg8[%c3_102, %c0_103, %c0_104] : memref<4x128x128xbf16, #tpu.memory_space<vmem>>, vector<1x128x128xbf16>
    %114 = vector.shape_cast %113 : vector<1x128x128xbf16> to vector<128x128xbf16>
    %cst_105 = arith.constant dense<0.000000e+00> : vector<4x128xf32>
    %115 = tpu.matmul %112, %114, %cst_105 {dimension_numbers = #tpu.dot_dimension_numbers<[1], [0], [0], [1], [0, 0, 1, 1], [], []>} : vector<4x128xbf16>, vector<128x128xbf16>, vector<4x128xf32> -> vector<4x128xf32>
    %116 = arith.addf %108, %115 : vector<4x128xf32>
    %c0_106 = arith.constant 0 : index
    %c0_107 = arith.constant 0 : index
    %117 = vector.load %arg9[%c0_106, %c0_107] : memref<1x128xf32, #tpu.memory_space<vmem>>, vector<1x128xf32>
    %118 = vector.broadcast %117 : vector<1x128xf32> to vector<4x128xf32>
    %119 = arith.addf %116, %118 : vector<4x128xf32>
    %cst_108 = arith.constant 0.000000e+00 : f32
    %120 = vector.broadcast %cst_108 : f32 to vector<4x128xf32>
    %121 = arith.maximumf %119, %120 : vector<4x128xf32>
    %c0_109 = arith.constant 0 : index
    %c0_110 = arith.constant 0 : index
    %c0_111 = arith.constant 0 : index
    %122 = vector.load %arg10[%c0_109, %c0_110, %c0_111] : memref<4x1x4xf32, #tpu.memory_space<vmem>>, vector<1x1x4xf32>
    %123 = vector.shape_cast %122 : vector<1x1x4xf32> to vector<1x4xf32>
    %cst_112 = arith.constant dense<0.000000e+00> : vector<1x128xf32>
    %124 = tpu.matmul %123, %121, %cst_112 {dimension_numbers = #tpu.dot_dimension_numbers<[1], [0], [0], [1], [0, 0, 1, 1], [], []>} : vector<1x4xf32>, vector<4x128xf32>, vector<1x128xf32> -> vector<1x128xf32>
    %125 = arith.truncf %124 : vector<1x128xf32> to vector<1x128xbf16>
    %c0_113 = arith.constant 0 : index
    %c0_114 = arith.constant 0 : index
    %c0_115 = arith.constant 0 : index
    %126 = vector.load %arg11[%c0_113, %c0_114, %c0_115] : memref<4x128x10xbf16, #tpu.memory_space<vmem>>, vector<1x128x10xbf16>
    %127 = vector.shape_cast %126 : vector<1x128x10xbf16> to vector<128x10xbf16>
    %cst_116 = arith.constant dense<0.000000e+00> : vector<1x10xf32>
    %128 = tpu.matmul %125, %127, %cst_116 {dimension_numbers = #tpu.dot_dimension_numbers<[1], [0], [0], [1], [0, 0, 1, 1], [], []>} : vector<1x128xbf16>, vector<128x10xbf16>, vector<1x10xf32> -> vector<1x10xf32>
    %c1_117 = arith.constant 1 : index
    %c0_118 = arith.constant 0 : index
    %c0_119 = arith.constant 0 : index
    %129 = vector.load %arg10[%c1_117, %c0_118, %c0_119] : memref<4x1x4xf32, #tpu.memory_space<vmem>>, vector<1x1x4xf32>
    %130 = vector.shape_cast %129 : vector<1x1x4xf32> to vector<1x4xf32>
    %cst_120 = arith.constant dense<0.000000e+00> : vector<1x128xf32>
    %131 = tpu.matmul %130, %121, %cst_120 {dimension_numbers = #tpu.dot_dimension_numbers<[1], [0], [0], [1], [0, 0, 1, 1], [], []>} : vector<1x4xf32>, vector<4x128xf32>, vector<1x128xf32> -> vector<1x128xf32>
    %132 = arith.truncf %131 : vector<1x128xf32> to vector<1x128xbf16>
    %c1_121 = arith.constant 1 : index
    %c0_122 = arith.constant 0 : index
    %c0_123 = arith.constant 0 : index
    %133 = vector.load %arg11[%c1_121, %c0_122, %c0_123] : memref<4x128x10xbf16, #tpu.memory_space<vmem>>, vector<1x128x10xbf16>
    %134 = vector.shape_cast %133 : vector<1x128x10xbf16> to vector<128x10xbf16>
    %cst_124 = arith.constant dense<0.000000e+00> : vector<1x10xf32>
    %135 = tpu.matmul %132, %134, %cst_124 {dimension_numbers = #tpu.dot_dimension_numbers<[1], [0], [0], [1], [0, 0, 1, 1], [], []>} : vector<1x128xbf16>, vector<128x10xbf16>, vector<1x10xf32> -> vector<1x10xf32>
    %136 = arith.addf %128, %135 : vector<1x10xf32>
    %c2_125 = arith.constant 2 : index
    %c0_126 = arith.constant 0 : index
    %c0_127 = arith.constant 0 : index
    %137 = vector.load %arg10[%c2_125, %c0_126, %c0_127] : memref<4x1x4xf32, #tpu.memory_space<vmem>>, vector<1x1x4xf32>
    %138 = vector.shape_cast %137 : vector<1x1x4xf32> to vector<1x4xf32>
    %cst_128 = arith.constant dense<0.000000e+00> : vector<1x128xf32>
    %139 = tpu.matmul %138, %121, %cst_128 {dimension_numbers = #tpu.dot_dimension_numbers<[1], [0], [0], [1], [0, 0, 1, 1], [], []>} : vector<1x4xf32>, vector<4x128xf32>, vector<1x128xf32> -> vector<1x128xf32>
    %140 = arith.truncf %139 : vector<1x128xf32> to vector<1x128xbf16>
    %c2_129 = arith.constant 2 : index
    %c0_130 = arith.constant 0 : index
    %c0_131 = arith.constant 0 : index
    %141 = vector.load %arg11[%c2_129, %c0_130, %c0_131] : memref<4x128x10xbf16, #tpu.memory_space<vmem>>, vector<1x128x10xbf16>
    %142 = vector.shape_cast %141 : vector<1x128x10xbf16> to vector<128x10xbf16>
    %cst_132 = arith.constant dense<0.000000e+00> : vector<1x10xf32>
    %143 = tpu.matmul %140, %142, %cst_132 {dimension_numbers = #tpu.dot_dimension_numbers<[1], [0], [0], [1], [0, 0, 1, 1], [], []>} : vector<1x128xbf16>, vector<128x10xbf16>, vector<1x10xf32> -> vector<1x10xf32>
    %144 = arith.addf %136, %143 : vector<1x10xf32>
    %c3_133 = arith.constant 3 : index
    %c0_134 = arith.constant 0 : index
    %c0_135 = arith.constant 0 : index
    %145 = vector.load %arg10[%c3_133, %c0_134, %c0_135] : memref<4x1x4xf32, #tpu.memory_space<vmem>>, vector<1x1x4xf32>
    %146 = vector.shape_cast %145 : vector<1x1x4xf32> to vector<1x4xf32>
    %cst_136 = arith.constant dense<0.000000e+00> : vector<1x128xf32>
    %147 = tpu.matmul %146, %121, %cst_136 {dimension_numbers = #tpu.dot_dimension_numbers<[1], [0], [0], [1], [0, 0, 1, 1], [], []>} : vector<1x4xf32>, vector<4x128xf32>, vector<1x128xf32> -> vector<1x128xf32>
    %148 = arith.truncf %147 : vector<1x128xf32> to vector<1x128xbf16>
    %c3_137 = arith.constant 3 : index
    %c0_138 = arith.constant 0 : index
    %c0_139 = arith.constant 0 : index
    %149 = vector.load %arg11[%c3_137, %c0_138, %c0_139] : memref<4x128x10xbf16, #tpu.memory_space<vmem>>, vector<1x128x10xbf16>
    %150 = vector.shape_cast %149 : vector<1x128x10xbf16> to vector<128x10xbf16>
    %cst_140 = arith.constant dense<0.000000e+00> : vector<1x10xf32>
    %151 = tpu.matmul %148, %150, %cst_140 {dimension_numbers = #tpu.dot_dimension_numbers<[1], [0], [0], [1], [0, 0, 1, 1], [], []>} : vector<1x128xbf16>, vector<128x10xbf16>, vector<1x10xf32> -> vector<1x10xf32>
    %152 = arith.addf %144, %151 : vector<1x10xf32>
    %c0_141 = arith.constant 0 : index
    %c0_142 = arith.constant 0 : index
    %153 = vector.load %arg12[%c0_141, %c0_142] : memref<1x10xf32, #tpu.memory_space<vmem>>, vector<1x10xf32>
    %154 = arith.addf %152, %153 : vector<1x10xf32>
    %c0_143 = arith.constant 0 : index
    %c0_144 = arith.constant 0 : index
    %c0_145 = arith.constant 0 : index
    %155 = vector.load %arg13[%c0_143, %c0_144, %c0_145] : memref<1x1x10xf32, #tpu.memory_space<vmem>>, vector<1x1x10xf32>
    %156 = vector.shape_cast %155 : vector<1x1x10xf32> to vector<1x10xf32>
    %157 = vector.shape_cast %154 : vector<1x10xf32> to vector<1x1x10xf32>
    tpu.vector_store %arg13[%c0_143, %c0_144, %c0_145], %157 {strides = array<i32>} : memref<1x1x10xf32, #tpu.memory_space<vmem>>, vector<1x1x10xf32>,
    return
  }
  func.func @transform_0(%arg0: i32) -> (i32, i32, i32) {
    %c0_i32 = arith.constant 0 : i32
    %c0_i32_0 = arith.constant 0 : i32
    %c0_i32_1 = arith.constant 0 : i32
    return %arg0, %c0_i32, %c0_i32_0 : i32, i32, i32
  }
  func.func @transform_1(%arg0: i32) -> (i32, i32) {
    %c0_i32 = arith.constant 0 : i32
    %c0_i32_0 = arith.constant 0 : i32
    %c0_i32_1 = arith.constant 0 : i32
    return %c0_i32, %c0_i32_0 : i32, i32
  }
  func.func @transform_2(%arg0: i32) -> (i32, i32) {
    %c0_i32 = arith.constant 0 : i32
    %c0_i32_0 = arith.constant 0 : i32
    %c0_i32_1 = arith.constant 0 : i32
    return %c0_i32, %c0_i32_0 : i32, i32
  }
  func.func @transform_3(%arg0: i32) -> (i32, i32, i32) {
    %c0_i32 = arith.constant 0 : i32
    %c0_i32_0 = arith.constant 0 : i32
    %c0_i32_1 = arith.constant 0 : i32
    %c0_i32_2 = arith.constant 0 : i32
    return %c0_i32, %c0_i32_0, %c0_i32_1 : i32, i32, i32
  }
  func.func @transform_4(%arg0: i32) -> (i32, i32, i32) {
    %c0_i32 = arith.constant 0 : i32
    %c0_i32_0 = arith.constant 0 : i32
    %c0_i32_1 = arith.constant 0 : i32
    %c0_i32_2 = arith.constant 0 : i32
    return %c0_i32, %c0_i32_0, %c0_i32_1 : i32, i32, i32
  }
  func.func @transform_5(%arg0: i32) -> (i32, i32) {
    %c0_i32 = arith.constant 0 : i32
    %c0_i32_0 = arith.constant 0 : i32
    %c0_i32_1 = arith.constant 0 : i32
    return %c0_i32, %c0_i32_0 : i32, i32
  }
  func.func @transform_6(%arg0: i32) -> (i32, i32, i32) {
    %c0_i32 = arith.constant 0 : i32
    %c0_i32_0 = arith.constant 0 : i32
    %c0_i32_1 = arith.constant 0 : i32
    %c0_i32_2 = arith.constant 0 : i32
    return %c0_i32, %c0_i32_0, %c0_i32_1 : i32, i32, i32
  }
  func.func @transform_7(%arg0: i32) -> (i32, i32, i32) {
    %c0_i32 = arith.constant 0 : i32
    %c0_i32_0 = arith.constant 0 : i32
    %c0_i32_1 = arith.constant 0 : i32
    %c0_i32_2 = arith.constant 0 : i32
    return %c0_i32, %c0_i32_0, %c0_i32_1 : i32, i32, i32
  }
  func.func @transform_8(%arg0: i32) -> (i32, i32) {
    %c0_i32 = arith.constant 0 : i32
    %c0_i32_0 = arith.constant 0 : i32
    %c0_i32_1 = arith.constant 0 : i32
    return %c0_i32, %c0_i32_0 : i32, i32
  }
  func.func @transform_9(%arg0: i32) -> (i32, i32, i32) {
    %c0_i32 = arith.constant 0 : i32
    %c0_i32_0 = arith.constant 0 : i32
    %c0_i32_1 = arith.constant 0 : i32
    %c0_i32_2 = arith.constant 0 : i32
    return %c0_i32, %c0_i32_0, %c0_i32_1 : i32, i32, i32
  }
  func.func @transform_10(%arg0: i32) -> (i32, i32, i32) {
    %c0_i32 = arith.constant 0 : i32
    %c0_i32_0 = arith.constant 0 : i32
    %c0_i32_1 = arith.constant 0 : i32
    %c0_i32_2 = arith.constant 0 : i32
    return %c0_i32, %c0_i32_0, %c0_i32_1 : i32, i32, i32
  }
  func.func @transform_11(%arg0: i32) -> (i32, i32) {
    %c0_i32 = arith.constant 0 : i32
    %c0_i32_0 = arith.constant 0 : i32
    %c0_i32_1 = arith.constant 0 : i32
    return %c0_i32, %c0_i32_0 : i32, i32
  }
  func.func @transform_12(%arg0: i32) -> (i32, i32, i32) {
    %c0_i32 = arith.constant 0 : i32
    %c0_i32_0 = arith.constant 0 : i32
    %c0_i32_1 = arith.constant 0 : i32
    return %arg0, %c0_i32, %c0_i32_0 : i32, i32, i32
  }
}

</mosaic_0001>

<bundles_post_ra>
// kernel: student_forward.1
= control target key start
LH: loop header
LB: loop body
LE: loop exit
PB: predicated region body
PF: predicated region fallthrough
CT: control target
= control target key end

     0   :  { %s6475_s0 = inlined_call_operand.vmem [shape: f32[2,49,27], index: 0, kind: input, shape index: {}]   ;;  %s6476_s1 = inlined_call_operand.vmem [shape: bf16[27,128], index: 1, kind: input, shape index: {}]   ;;  %s6477_s2 = inlined_call_operand.vmem [shape: f32[1,128], index: 2, kind: input, shape index: {}]   ;;  %s6478_s3 = inlined_call_operand.vmem [shape: f32[9,9,49], index: 3, kind: input, shape index: {}]   ;;  %s6479_s4 = inlined_call_operand.vmem [shape: bf16[9,128,128], index: 4, kind: input, shape index: {}]   ;;  %s6480_s5 = inlined_call_operand.vmem [shape: f32[1,128], index: 5, kind: input, shape index: {}]   ;;  %s6481_s6 = inlined_call_operand.vmem [shape: f32[4,4,9], index: 6, kind: input, shape index: {}]   ;;  %s6482_s7 = inlined_call_operand.vmem [shape: bf16[4,128,128], index: 7, kind: input, shape index: {}]   ;;  %s6483_s8 = inlined_call_operand.vmem [shape: f32[1,128], index: 8, kind: input, shape index: {}]   ;;  %s6484_s9 = inlined_call_operand.vmem [shape: f32[4,1,4], index: 9, kind: input, shape index: {}]   ;;  %s6485_s10 = inlined_call_operand.vmem [shape: bf16[4,128,10], index: 10, kind: input, shape index: {}]   ;;  %s6486_s11 = inlined_call_operand.vmem [shape: f32[1,10], index: 11, kind: input, shape index: {}]   ;;  %s6487_s12 = inlined_call_operand.hbm [shape: f32[2,1,10], index: 12, kind: output, shape index: {}]  }
   0x1   :  { %6488 = sst [smem:[#allocation5_spill]] %s6475_s0 }
   0x2   :  { %6489 = sst [smem:[#allocation6_spill]] %s6476_s1 }
   0x3   :  { %17 = vsyncpa [#allocation3], 0 }
   0x4   :  { %19 = vsyncpa [#allocation3 + $0x1], 0  ;;  %s5518_s21 = smov 0   ;;  %s5520_s22 = smov 0  }
   0x5   :  { %s5522_s23 = smov 0   ;;  %s5524_s24 = smov 0  }
   0x6 LB: > { %s5539_s25 = sadd.s32 4294967295, %s5445_s24   ;;  %s3821_s26 = sadd.s32 4294967294, %s5445_s24   ;;  %s5445_s24 = sphi %s5524_s24, %s6499_s24   ;;  %s5441_s23 = sphi %s5522_s23, %s6498_s23   ;;  %s5437_s22 = sphi %s5520_s22, %s6497_s22   ;;  %s5433_s21 = sphi %s5518_s21, %s6496_s21  }
   0x7   : > { %s5543_s27 = sadd.s32 1, %s5445_s24   ;;  %s289_s28 = sadd.s32 1, %s5441_s23 }
   0x8   : > { %s286_s29 = ssub.s32 %s5445_s24, %s5543_s27  ;;  %p299_p0 = scmp.ne.s32.totalorder %s5441_s23, %s5437_s22 }
   0x9   : > { %p287_p1 = scmp.eq.s32.totalorder %s286_s29, 0  ;;  %p300_p2 = scmp.eq.s32.totalorder %s5539_s25, 1 }
   0xa   : > { %p305_p3 = scmp.ne.s32.totalorder %s5437_s22, %s5433_s21  ;;  %p306_p4 = scmp.eq.s32.totalorder %s3821_s26, 1 }
   0xb   : > { %s5554_s30 = scalar_select %p287_p1, %s5441_s23, %s289_s28  }
   0xc   : > { %p5556_p5 = por %p300_p2, %p299_p0  ;;  %p5560_p6 = por %p306_p4, %p305_p3 }
   0xd   : > { %p3824_p7 = scmp.ge.s32.totalorder %s5445_s24, 1  ;;  %p365_p8 = scmp.lt.s32.totalorder %s5445_s24, 3 }
   0xf   : > { %p366_p9 = pnand %p3824_p7, %p365_p8 }
  0x10   : > { %s6492_s1 = sld [smem:[#allocation6_spill]] (!%p366_p9)  ;;  %vm458_vm0 = vcmask (!%p366_p9), 1044480   ;;  %vm459_vm1 = vcmask (!%p366_p9), 1045504   ;;  %p406_p10 = scmp.lt.s32.totalorder (!%p366_p9), %s5539_s25, 1  ;;  %v5447_v2 = vmov (!%p366_p9), 65535   ;;  %vm445_vm2 = vcmask (!%p366_p9), 220160  }
  0x11   : > { %369 = sbr.rel (%p366_p9) target bundleno = 2957 (0xb8d), region = 68  ;;  %v460_v3 = vsel (!%p366_p9), %vm458_vm0, 4294967295, %v5447_v2  ;;  %s6493_s0 = sld [smem:[#allocation5_spill]] (!%p366_p9)  ;;  %v536_v17 = vld [vmem:[%s6478_s3] sm:$0xff] (!%p366_p9)  ;;  %vm538_vm3 = vcmask (!%p366_p9), 400384   ;;  %v3836_v18 = vld [vmem:[%s6478_s3 + $0x10] sm:$0xff] (!%p366_p9) }
  0x12   : > { %v461_v4 = vsel (!%p366_p9), %vm459_vm1, %v460_v3, 0  ;;  %4549 = vmatprep.mubr.msk.f32.mxu1 (!%p366_p9), %vm538_vm3, %v536_v17  ;;  %v3826_v19 = vld [vmem:[%s6477_s2] ss:$0 sm:$0xff] (!%p366_p9)  ;;  %vm545_vm4 = vcmask (!%p366_p9), 1040384   ;;  %v537_v45 = vld [vmem:[%s6478_s3 + $0x8] sm:$0x1] (!%p366_p9) }
  0x13   : > { %v3837_v46 = vld [vmem:[%s6478_s3 + $0x18] sm:$0x1] (!%p366_p9)  ;;  %v5247_v47 = vld [vmem:[%s6479_s4 + $0x40] sm:$0xff] (!%p366_p9)   ;;  %v5448_v49 = vmov (!%p366_p9), 0.0   ;;  %v5248_v50 = vld [vmem:[%s6479_s4 + $0x48] sm:$0xff] (!%p366_p9)   ;;  %vm5449_vm5 = vmmov (!%p366_p9), 0  }
  0x14   : > { %v5255_v48 = vld [vmem:[%s6479_s4] sm:$0xff] (!%p366_p9)   ;;  %v5256_v51 = vld [vmem:[%s6479_s4 + $0x8] sm:$0xff] (!%p366_p9)   ;;  %v5249_v52 = vld [vmem:[%s6479_s4 + $0x50] sm:$0xff] (!%p366_p9)   ;;  %vm5451_vm6 = vmmov (!%p366_p9), 1   ;;  %vm2284_vm8 = vcmask (!%p366_p9), 72704   ;;  %vm3025_vm9 = vcmask (!%p366_p9), 1043456  }
  0x15   : > { %v5257_v53 = vld [vmem:[%s6479_s4 + $0x10] sm:$0xff] (!%p366_p9)   ;;  %v5250_v54 = vld [vmem:[%s6479_s4 + $0x58] sm:$0xff] (!%p366_p9)   ;;  %v5251_v56 = vld [vmem:[%s6479_s4 + $0x60] sm:$0xff] (!%p366_p9)   ;;  %vm3021_vm10 = vcmask (!%p366_p9), 31744   ;;  %s404_s26 = sand.u32 (!%p366_p9), 1, %s5437_s22   ;;  %s4260_s15 = sshll.u32 (!%p366_p9), %s5539_s25, 4 }
  0x16   : > { %v5245_v0 = vld [vmem:[%s6492_s1] sm:$0xff] (!%p366_p9)   ;;  %v5246_v1 = vld [vmem:[%s6492_s1 + $0x8] sm:$0x3f] (!%p366_p9)   ;;  %v5258_v55 = vld [vmem:[%s6479_s4 + $0x18] sm:$0xff] (!%p366_p9)   ;;  %s405_s16 = scalar_lea.vmem (!%p366_p9), [#allocation2], %s404_s26  ;;  %vm3751_vm11 = vcmask (!%p366_p9), 73728  }
  0x17   : > { %4523 = vmatprep.subr.bf16.mxu0 (!%p366_p9), %v5245_v0  ;;  %v463_v5 = vand.u32 (!%p366_p9), %v5246_v1, %v461_v4  ;;  %v5259_v57 = vld [vmem:[%s6479_s4 + $0x20] sm:$0xff] (!%p366_p9)   ;;  %v5252_v58 = vld [vmem:[%s6479_s4 + $0x68] sm:$0xff] (!%p366_p9)   ;;  %v5253_v60 = vld [vmem:[%s6479_s4 + $0x70] sm:$0xff] (!%p366_p9)   ;;  %s3766_s17 = sshll.u32 (!%p366_p9), %s405_s16, 4  ;;  %s6435_s17 = int_to_ptr.vmem [resolvable:$true] %s3766_s17 }
  0x18   : > { %4524 = vmatpush3.bf16.msra.mxu0 %v5245_v0  ;;  %s407_s19 = scalar_select %p406_p10, %s5539_s25, 1  ;;  %v5260_v59 = vld [vmem:[%s6479_s4 + $0x28] sm:$0xff]   ;;  %v5261_v61 = vld [vmem:[%s6479_s4 + $0x30] sm:$0xff]   ;;  %v5254_v62 = vld [vmem:[%s6479_s4 + $0x78] sm:$0xff]  }
  0x19   : > { %4525 = vmatprep.subr.bf16.mxu0 %v463_v5  ;;  %v5262_v63 = vld [vmem:[%s6479_s4 + $0x38] sm:$0xff]   ;;  %v5263_v4 = vld [vmem:[%s6479_s4 + $0x80] sm:$0xff]   ;;  %vm6110_vm7 = vmpackc.low %vm545_vm4, %vm5451_vm6  ;;  %s3754_s25 = scalar_lea.sflag [#allocation3], %s404_s26  ;;  %s5383_s28 = scalar_lea.vmem %s6435_s17, 16 }
  0x1a   : > { %s5200_s20 = smul.u32 56, %s407_s19  ;;  %v5270_v17 = vld [vmem:[%s6479_s4 + $0xb8] sm:$0xff]   ;;  %p5384_p11 = scmp.ne.s32.totalorder %s6435_s17, %s5383_s28 }
  0x1c   : > { %4526 = vmatpush3.bf16.msra.mxu0 %v463_v5  ;;  %s410_s29 = scalar_lea.vmem %s6493_s0, %s5200_s20  ;;  %s6433_s20 = scalar_lea.hbm %s6487_s12, %s4260_s15 }
  0x1d   : > { %v412_v6 = vld [vmem:[%s410_s29] sm:$0xff]  ;;  %v413_v7 = vld [vmem:[%s410_s29 + $0x8] sm:$0xff]  ;;  %v414_v8 = vld [vmem:[%s410_s29 + $0x10] sm:$0xff]  ;;  %p5385_p12 = pnand %p5384_p11, %p5556_p5 }
  0x1e   : > { %v419_v9 = vpack.c.bf16 %v413_v7, %v412_v6  ;;  %v415_v10 = vld [vmem:[%s410_s29 + $0x18] sm:$0xff]  ;;  %v416_v11 = vld [vmem:[%s410_s29 + $0x20] sm:$0xff]  ;;  %v417_v12 = vld [vmem:[%s410_s29 + $0x28] sm:$0xff] }
  0x1f   : > { %v420_v13 = vpack.c.bf16 %v415_v10, %v414_v8  ;;  %v421_v14 = vpack.c.bf16 %v417_v12, %v416_v11  ;;  %v418_v15 = vld [vmem:[%s410_s29 + $0x30] sm:$0x1]  ;;  %v3873_v7 = vld [vmem:[%s6478_s3 + $0x20] sm:$0xff]  ;;  %v5264_v8 = vld [vmem:[%s6479_s4 + $0x88] sm:$0xff]   ;;  %p5386_p13 = pneg %p5385_p12  ;;  %s5452_s29 = smov [#allocation2]  }
  0x20   : > { %4527 = vmatprep.mubr.msk.bf16.mxu0 %vm445_vm2, %v419_v9  ;;  %v422_v16 = vpack.c.bf16 %v418_v15, %v418_v15  ;;  %v5265_v9 = vld [vmem:[%s6479_s4 + $0x90] sm:$0xff]   ;;  %v5266_v10 = vld [vmem:[%s6479_s4 + $0x98] sm:$0xff]   ;;  %v3874_v11 = vld [vmem:[%s6478_s3 + $0x28] sm:$0x1]  ;;  %s5387_s0 = sshll.u32 %s5452_s29, 4  ;;  %s5388_s0 = int_to_ptr.vmem [resolvable:$false] %s5387_s0 }
  0x21   : > { %4528 = vmatmul.mubr.msk.bf16.vlgmr.msra.gmra.mrb[0].mxu0 %vm445_vm2, %v420_v13  ;;  %v5267_v12 = vld [vmem:[%s6479_s4 + $0xa0] sm:$0xff]   ;;  %v3902_v13 = vld [vmem:[%s6478_s3 + $0x30] sm:$0xff]  ;;  %s5389_s1 = scalar_lea.vmem %s5388_s0, 32  ;;  %p5390_p0 = scmp.lt.s32.totalorder %s6435_s17, %s5388_s0 }
  0x22   : > { %4531 = vmatprep.mubr.msk.bf16.mxu0 %vm445_vm2, %v421_v14  ;;  %v5268_v14 = vld [vmem:[%s6479_s4 + $0xa8] sm:$0xff]   ;;  %v5269_v15 = vld [vmem:[%s6479_s4 + $0xb0] sm:$0xff]   ;;  %p5391_p1 = scmp.lt.s32.totalorder %s5389_s1, %s5383_s28 }
  0x24   : > { %p5392_p2 = por %p5391_p1, %p5390_p0 }
  0x26   : > { %p5393_p3 = pnand %p5392_p2, %p5386_p13 }
  0x29   : > { %4532 = vmatmul.mubr.msk.bf16.gmra.mrb[4].mxu0 %vm445_vm2, %v422_v16  ;;  %v3903_v16 = vld [vmem:[%s6478_s3 + $0x38] sm:$0x1] }
  0x2a   : > { %4566 = vmatprep.mubr.msk.f32.mxu0 %vm538_vm3, %v3836_v18  ;;  %v5271_v18 = vld [vmem:[%s6479_s4 + $0xc0] sm:$0xff]  }
  0xf4   : > { %v4529_v20 = vpop.f32.mrb[0].mxu0 }
  0xf5   : > { %v508_v21 = vadd.f32 %v4529_v20, %v3826_v19  ;;  %v499_v22 = vpop.f32.mrb[1].mxu0  ;;  %v5273_v20 = vld [vmem:[%s6479_s4 + $0xd0] sm:$0xff]  }
  0xf6   : > { %v500_v23 = vadd.f32 %v3826_v19, %v499_v22  ;;  %v4530_v24 = vpop.f32.mrb[2].mxu0  ;;  %v5275_v22 = vld [vmem:[%s6479_s4 + $0xe0] sm:$0xff]  }
  0xf7   : > { %v511_v25 = vadd.f32 %v4530_v24, %v3826_v19  ;;  %v502_v26 = vpop.f32.mrb[3].mxu0  ;;  %v531_v28 = vmax.f32 %v508_v21, 0.0  ;;  %v5274_v21 = vld [vmem:[%s6479_s4 + $0xd8] sm:$0xff]   ;;  %v5277_v24 = vld [vmem:[%s6479_s4 + $0xf0] sm:$0xff]  }
  0xf8   : > { %v503_v27 = vadd.f32 %v3826_v19, %v502_v26  ;;  %v529_v30 = vmax.f32 %v500_v23, 0.0  ;;  %v5276_v23 = vld [vmem:[%s6479_s4 + $0xe8] sm:$0xff]  }
  0xf9   : > { %v532_v29 = vmax.f32 %v511_v25, 0.0  ;;  %v5278_v25 = vld [vmem:[%s6479_s4 + $0xf8] sm:$0xff]  }
  0xfa   : > { %v530_v31 = vmax.f32 %v503_v27, 0.0 }
  0xfb   : > { %v5588_v32 = vpack.c.bf16 %v532_v29, %v531_v28 }
  0xfc   : > { %v5590_v33 = vpack.c.bf16 %v530_v31, %v529_v30  ;;  %v4533_v34 = vpop.f32.mrb[4].mxu0 }
  0xfd   : > { %v515_v35 = vpop.f32.mrb[5].mxu0  ;;  %v524_v40 = vadd.f32 %v4533_v34, %v3826_v19 }
  0xfe   : > { %v516_v36 = vadd.f32 %v3826_v19, %v515_v35  ;;  %v4534_v37 = vpop.f32.mrb[6].mxu0  ;;  %5077 = vmatprep.subr.bf16.mxu1 %v5590_v33  ;;  %5089 = vmatprep.subr.bf16.mxu0 %v5590_v33 }
  0xff   : > { %v518_v38 = vpop.f32.mrb[7].mxu0  ;;  %5079 = vmatpush3.bf16.msra.mxu1 %v5590_v33  ;;  %5091 = vmatpush3.bf16.msra.mxu0 %v5590_v33  ;;  %v5602_v44 = vmax.f32 %v524_v40, 0.0 }
 0x100   : > { %v519_v39 = vadd.f32 %v3826_v19, %v518_v38  ;;  %5081 = vmatprep.subr.bf16.mxu1 %v5588_v32  ;;  %5093 = vmatprep.subr.bf16.mxu0 %v5588_v32  ;;  %v533_v41 = vmax.f32 %v516_v36, 0.0  ;;  %v5272_v19 = vld [vmem:[%s6479_s4 + $0xc8] sm:$0xff]  }
 0x102   : > { %v534_v42 = vmax.f32 %v519_v39, 0.0 }
 0x103   : > { %5083 = vmatpush3.bf16.msra.mxu1 %v5588_v32  ;;  %5095 = vmatpush3.bf16.msra.mxu0 %v5588_v32 }
 0x104   : > { %v5600_v43 = vpack.c.bf16 %v534_v42, %v533_v41  ;;  %v3931_v41 = vld [vmem:[%s6478_s3 + $0x40] sm:$0xff] }
 0x106   : > { %5085 = vmatprep.subr.bf16.mxu1 %v5600_v43  ;;  %5097 = vmatprep.subr.bf16.mxu0 %v5600_v43 }
 0x107   : > { %5087 = vmatpush3.bf16.msra.mxu1 %v5600_v43  ;;  %5099 = vmatpush3.bf16.msra.mxu0 %v5600_v43 }
 0x108   : > { %4547 = vmatprep.subr.msk.mxu1 %vm545_vm4, %v5602_v44  ;;  %4564 = vmatprep.subr.msk.mxu0 %vm545_vm4, %v5602_v44 }
 0x10b   : > { %4548 = vmatpush3.msk.msra.mxu1 %vm545_vm4, %v5602_v44  ;;  %4565 = vmatpush3.msk.msra.mxu0 %vm545_vm4, %v5602_v44 }
 0x10c   : > { %4550 = vmatmul.mubr.msk.f32.vlgmr.msra.gmra.mrb[0].mxu1 %vm538_vm3, %v537_v45  ;;  %4567 = vmatmul.mubr.msk.f32.vlgmr.msra.gmra.mrb[8].mxu0 %vm538_vm3, %v3837_v46  ;;  %v3932_v46 = vld [vmem:[%s6478_s3 + $0x48] sm:$0x1] }
 0x10d   : > { %4569 = vmatprep.subr.bf16.mxu1 %v5448_v49  ;;  %4589 = vmatprep.subr.bf16.mxu0 %v5448_v49 }
 0x10e   : > { %4570 = vmatpush3.bf16.msra.mxu1 %v5247_v47  ;;  %4590 = vmatpush3.bf16.msra.mxu0 %v5255_v48  ;;  %v5279_v47 = vld [vmem:[%s6479_s4 + $0x100] sm:$0xff]  }
 0x10f   : > { %4571 = vmatprep.subr.bf16.mxu1 %v5448_v49  ;;  %4591 = vmatprep.subr.bf16.mxu0 %v5448_v49 }
 0x110   : > { %4585 = vmatprep.mubr.msk.bf16.mxu1 %vm5449_vm5, %v5448_v49  ;;  %4605 = vmatprep.mubr.msk.bf16.mxu0 %vm5449_vm5, %v5448_v49 }
 0x112   : > { %4572 = vmatpush3.bf16.msra.mxu1 %v5248_v50  ;;  %4592 = vmatpush3.bf16.msra.mxu0 %v5256_v51  ;;  %v3960_v50 = vld [vmem:[%s6478_s3 + $0x50] sm:$0xff]  ;;  %v5280_v51 = vld [vmem:[%s6479_s4 + $0x108] sm:$0xff]  }
 0x113   : > { %4573 = vmatprep.subr.bf16.mxu1 %v5448_v49  ;;  %4593 = vmatprep.subr.bf16.mxu0 %v5448_v49 }
 0x116   : > { %4574 = vmatpush3.bf16.msra.mxu1 %v5249_v52  ;;  %4594 = vmatpush3.bf16.msra.mxu0 %v5257_v53  ;;  %v5281_v52 = vld [vmem:[%s6479_s4 + $0x110] sm:$0xff]   ;;  %v5282_v53 = vld [vmem:[%s6479_s4 + $0x118] sm:$0xff]  }
 0x117   : > { %4575 = vmatprep.subr.bf16.mxu1 %v5448_v49  ;;  %4595 = vmatprep.subr.bf16.mxu0 %v5448_v49 }
 0x11a   : > { %4576 = vmatpush3.bf16.msra.mxu1 %v5250_v54  ;;  %4596 = vmatpush3.bf16.msra.mxu0 %v5258_v55  ;;  %v3961_v54 = vld [vmem:[%s6478_s3 + $0x58] sm:$0x1]  ;;  %v5283_v55 = vld [vmem:[%s6479_s4 + $0x140] sm:$0xff]  }
 0x11b   : > { %4577 = vmatprep.subr.bf16.mxu1 %v5448_v49  ;;  %4597 = vmatprep.subr.bf16.mxu0 %v5448_v49 }
 0x11e   : > { %4578 = vmatpush3.bf16.msra.mxu1 %v5251_v56  ;;  %4598 = vmatpush3.bf16.msra.mxu0 %v5259_v57  ;;  %v5284_v56 = vld [vmem:[%s6479_s4 + $0x120] sm:$0xff]   ;;  %v5285_v57 = vld [vmem:[%s6479_s4 + $0x148] sm:$0xff]  }
 0x11f   : > { %4579 = vmatprep.subr.bf16.mxu1 %v5448_v49  ;;  %4599 = vmatprep.subr.bf16.mxu0 %v5448_v49 }
 0x122   : > { %4580 = vmatpush3.bf16.msra.mxu1 %v5252_v58  ;;  %4600 = vmatpush3.bf16.msra.mxu0 %v5260_v59  ;;  %v5286_v58 = vld [vmem:[%s6479_s4 + $0x128] sm:$0xff]   ;;  %v5287_v59 = vld [vmem:[%s6479_s4 + $0x150] sm:$0xff]  }
 0x123   : > { %4581 = vmatprep.subr.bf16.mxu1 %v5448_v49  ;;  %4601 = vmatprep.subr.bf16.mxu0 %v5448_v49 }
 0x126   : > { %4582 = vmatpush3.bf16.msra.mxu1 %v5253_v60  ;;  %4602 = vmatpush3.bf16.msra.mxu0 %v5261_v61  ;;  %v5288_v60 = vld [vmem:[%s6479_s4 + $0x130] sm:$0xff]   ;;  %v5289_v61 = vld [vmem:[%s6479_s4 + $0x158] sm:$0xff]  }
 0x127   : > { %4583 = vmatprep.subr.bf16.mxu1 %v5448_v49  ;;  %4603 = vmatprep.subr.bf16.mxu0 %v5448_v49 }
 0x12a   : > { %4584 = vmatpush3.bf16.msra.mxu1 %v5254_v62  ;;  %4604 = vmatpush3.bf16.msra.mxu0 %v5262_v63  ;;  %v5290_v62 = vld [vmem:[%s6479_s4 + $0x138] sm:$0xff]   ;;  %v5291_v63 = vld [vmem:[%s6479_s4 + $0x160] sm:$0xff]  }
 0x12b   : > { %5101 = vmatprep.subr.bf16.mxu1 %v5590_v33  ;;  %4626 = vmatprep.subr.bf16.mxu0 %v5448_v49 }
 0x1df   : > { %v4551_v0 = vpop.f32.mrb[0].mxu1  ;;  %v4568_v1 = vpop.f32.mrb[8].mxu0 }
 0x1e0   : > { %v615_v2 = vpop.f32.mrb[1].mxu1  ;;  %v716_v3 = vpop.f32.mrb[9].mxu0 }
 0x1e1   : > { %v624_v5 = vpack.c.bf16 %v4551_v0, %v615_v2  ;;  %v725_v6 = vpack.c.bf16 %v4568_v1, %v716_v3  ;;  %v5292_v0 = vld [vmem:[%s6479_s4 + $0x168] sm:$0xff]   ;;  %v5293_v1 = vld [vmem:[%s6479_s4 + $0x170] sm:$0xff]   ;;  %v5294_v2 = vld [vmem:[%s6479_s4 + $0x178] sm:$0xff]  }
 0x1e3   : > { %4586 = vmatmul.mubr.bf16.vlgmr.msra.gmra.mrb[4].mxu1 %v725_v6  ;;  %4606 = vmatmul.mubr.bf16.vlgmr.msra.gmra.mrb[12].mxu0 %v624_v5 }
 0x1e4   : > { %5103 = vmatpush3.bf16.msra.mxu1 %v5590_v33  ;;  %4627 = vmatpush3.bf16.msra.mxu0 %v5263_v4 }
 0x1e5   : > { %5105 = vmatprep.subr.bf16.mxu1 %v5588_v32  ;;  %4628 = vmatprep.subr.bf16.mxu0 %v5448_v49 }
 0x1e6   : > { %4623 = vmatprep.mubr.msk.f32.mxu1 %vm538_vm3, %v3873_v7  ;;  %4642 = vmatprep.mubr.msk.bf16.mxu0 %vm5449_vm5, %v5448_v49 }
 0x1e8   : > { %5107 = vmatpush3.bf16.msra.mxu1 %v5588_v32  ;;  %4629 = vmatpush3.bf16.msra.mxu0 %v5264_v8 }
 0x1e9   : > { %5109 = vmatprep.subr.bf16.mxu1 %v5600_v43  ;;  %4630 = vmatprep.subr.bf16.mxu0 %v5448_v49 }
 0x1ec   : > { %5111 = vmatpush3.bf16.msra.mxu1 %v5600_v43  ;;  %4631 = vmatpush3.bf16.msra.mxu0 %v5265_v9 }
 0x1ed   : > { %4621 = vmatprep.subr.msk.mxu1 %vm545_vm4, %v5602_v44  ;;  %4632 = vmatprep.subr.bf16.mxu0 %v5448_v49 }
 0x1f0   : > { %4622 = vmatpush3.msk.msra.mxu1 %vm545_vm4, %v5602_v44  ;;  %4633 = vmatpush3.bf16.msra.mxu0 %v5266_v10 }
 0x1f1   : > { %4624 = vmatmul.mubr.msk.f32.vlgmr.msra.gmra.mrb[2].mxu1 %vm538_vm3, %v3874_v11  ;;  %5113 = vmatprep.subr.bf16.mxu1 %v5590_v33 }
 0x1f2   : > { %5115 = vmatpush3.bf16.msra.mxu1 %v5590_v33  ;;  %4634 = vmatprep.subr.bf16.mxu0 %v5448_v49 }
 0x1f3   : > { %5117 = vmatprep.subr.bf16.mxu1 %v5588_v32  ;;  %4660 = vmatprep.mubr.msk.f32.mxu1 %vm538_vm3, %v3902_v13 }
 0x1f4   : > { %4635 = vmatpush3.bf16.msra.mxu0 %v5267_v12 }
 0x1f5   : > { %4636 = vmatprep.subr.bf16.mxu0 %v5448_v49 }
 0x1f6   : > { %5119 = vmatpush3.bf16.msra.mxu1 %v5588_v32 }
 0x1f7   : > { %5121 = vmatprep.subr.bf16.mxu1 %v5600_v43 }
 0x1f8   : > { %4637 = vmatpush3.bf16.msra.mxu0 %v5268_v14 }
 0x1f9   : > { %4638 = vmatprep.subr.bf16.mxu0 %v5448_v49 }
 0x1fa   : > { %5123 = vmatpush3.bf16.msra.mxu1 %v5600_v43 }
 0x1fb   : > { %4658 = vmatprep.subr.msk.mxu1 %vm545_vm4, %v5602_v44 }
 0x1fc   : > { %4639 = vmatpush3.bf16.msra.mxu0 %v5269_v15  ;;  %v3989_v15 = vld [vmem:[%s6478_s3 + $0x60] sm:$0xff] }
 0x1fd   : > { %4640 = vmatprep.subr.bf16.mxu0 %v5448_v49 }
 0x1fe   : > { %4659 = vmatpush3.msk.msra.mxu1 %vm545_vm4, %v5602_v44 }
 0x1ff   : > { %4661 = vmatmul.mubr.msk.f32.vlgmr.msra.gmra.mrb[8].mxu1 %vm538_vm3, %v3903_v16  ;;  %4663 = vmatprep.subr.bf16.mxu1 %v5448_v49 }
 0x200   : > { %4641 = vmatpush3.bf16.msra.mxu0 %v5270_v17  ;;  %4664 = vmatpush3.bf16.msra.mxu1 %v5271_v18 }
 0x201   : > { %5125 = vmatprep.subr.bf16.mxu0 %v5590_v33  ;;  %4665 = vmatprep.subr.bf16.mxu1 %v5448_v49 }
 0x202   : > { %4679 = vmatprep.mubr.msk.bf16.mxu1 %vm5449_vm5, %v5448_v49 }
 0x204   : > { %4666 = vmatpush3.bf16.msra.mxu1 %v5272_v19 }
 0x205   : > { %4667 = vmatprep.subr.bf16.mxu1 %v5448_v49 }
 0x208   : > { %4668 = vmatpush3.bf16.msra.mxu1 %v5273_v20  ;;  %v3990_v20 = vld [vmem:[%s6478_s3 + $0x68] sm:$0x1] }
 0x209   : > { %4669 = vmatprep.subr.bf16.mxu1 %v5448_v49 }
 0x20c   : > { %4670 = vmatpush3.bf16.msra.mxu1 %v5274_v21  ;;  %v5295_v21 = vld [vmem:[%s6479_s4 + $0x180] sm:$0xff]  }
 0x20d   : > { %4671 = vmatprep.subr.bf16.mxu1 %v5448_v49 }
 0x210   : > { %4672 = vmatpush3.bf16.msra.mxu1 %v5275_v22 }
 0x211   : > { %4673 = vmatprep.subr.bf16.mxu1 %v5448_v49 }
 0x214   : > { %4674 = vmatpush3.bf16.msra.mxu1 %v5276_v23 }
 0x215   : > { %4675 = vmatprep.subr.bf16.mxu1 %v5448_v49 }
 0x218   : > { %4676 = vmatpush3.bf16.msra.mxu1 %v5277_v24  ;;  %v4018_v24 = vld [vmem:[%s6478_s3 + $0x70] sm:$0xff] }
 0x219   : > { %4677 = vmatprep.subr.bf16.mxu1 %v5448_v49 }
 0x21c   : > { %4678 = vmatpush3.bf16.msra.mxu1 %v5278_v25  ;;  %v5296_v25 = vld [vmem:[%s6479_s4 + $0x188] sm:$0xff]  }
 0x21d   : > { %5137 = vmatprep.subr.bf16.mxu1 %v5590_v33 }
 0x2b6   : > { %v825_v26 = vpop.f32.mrb[4].mxu1  ;;  %v914_v27 = vpop.f32.mrb[12].mxu0 }
 0x2b7   : > { %v5798_v28 = vadd.f32 %v914_v27, %v825_v26  ;;  %v4587_v29 = vpop.f32.mrb[5].mxu1  ;;  %v4607_v30 = vpop.f32.mrb[13].mxu0  ;;  %v5297_v26 = vld [vmem:[%s6479_s4 + $0x190] sm:$0xff]   ;;  %v5298_v27 = vld [vmem:[%s6479_s4 + $0x198] sm:$0xff]  }
 0x2b8   : > { %v828_v31 = vpop.f32.mrb[6].mxu1  ;;  %v917_v34 = vpop.f32.mrb[14].mxu0  ;;  %v5299_v29 = vld [vmem:[%s6479_s4 + $0x1a0] sm:$0xff]   ;;  %v5300_v30 = vld [vmem:[%s6479_s4 + $0x1a8] sm:$0xff]  }
 0x2b9   : > { %v5800_v35 = vadd.f32 %v917_v34, %v828_v31  ;;  %v4588_v36 = vpop.f32.mrb[7].mxu1  ;;  %v4608_v37 = vpop.f32.mrb[15].mxu0  ;;  %v5301_v31 = vld [vmem:[%s6479_s4 + $0x1b0] sm:$0xff]   ;;  %v5302_v34 = vld [vmem:[%s6479_s4 + $0x1b8] sm:$0xff]  }
 0x2ba   : > { %v5304_v36 = vld [vmem:[%s6479_s4 + $0x1c8] sm:$0xff]   ;;  %v5305_v37 = vld [vmem:[%s6479_s4 + $0x1d0] sm:$0xff]  }
 0x2c4   : > { %v4625_v38 = vpop.f32.mrb[2].mxu1 }
 0x2c5   : > { %v996_v39 = vpop.f32.mrb[3].mxu1 }
 0x2c6   : > { %v1005_v40 = vpack.c.bf16 %v4625_v38, %v996_v39  ;;  %v5306_v38 = vld [vmem:[%s6479_s4 + $0x1d8] sm:$0xff]   ;;  %v5307_v39 = vld [vmem:[%s6479_s4 + $0x1e0] sm:$0xff]  }
 0x2c8   : > { %4643 = vmatmul.mubr.bf16.vlgmr.msra.gmra.mrb[16].mxu0 %v1005_v40  ;;  %v5308_v40 = vld [vmem:[%s6479_s4 + $0x1e8] sm:$0xff]  }
 0x2c9   : > { %5127 = vmatpush3.bf16.msra.mxu0 %v5590_v33  ;;  %4697 = vmatprep.mubr.msk.f32.mxu0 %vm538_vm3, %v3931_v41  ;;  %v5309_v41 = vld [vmem:[%s6479_s4 + $0x1f0] sm:$0xff]  }
 0x2ca   : > { %5129 = vmatprep.subr.bf16.mxu0 %v5588_v32 }
 0x2cd   : > { %5131 = vmatpush3.bf16.msra.mxu0 %v5588_v32 }
 0x2ce   : > { %5133 = vmatprep.subr.bf16.mxu0 %v5600_v43 }
 0x2d1   : > { %5135 = vmatpush3.bf16.msra.mxu0 %v5600_v43 }
 0x2d2   : > { %4695 = vmatprep.subr.msk.mxu0 %vm545_vm4, %v5602_v44  ;;  %v4662_v42 = vpop.f32.mrb[8].mxu1 }
 0x2d3   : > { %v1189_v45 = vpop.f32.mrb[9].mxu1 }
 0x2d4   : > { %v1198_v48 = vpack.c.bf16 %v4662_v42, %v1189_v45  ;;  %v5310_v42 = vld [vmem:[%s6479_s4 + $0x1f8] sm:$0xff]  }
 0x2d5   : > { %4696 = vmatpush3.msk.msra.mxu0 %vm545_vm4, %v5602_v44 }
 0x2d6   : > { %4698 = vmatmul.mubr.msk.f32.vlgmr.msra.gmra.mrb[10].mxu0 %vm538_vm3, %v3932_v46  ;;  %4700 = vmatprep.subr.bf16.mxu0 %v5448_v49 }
 0x2d7   : > { %4680 = vmatmul.mubr.bf16.vlgmr.msra.gmra.mrb[12].mxu1 %v1198_v48  ;;  %4701 = vmatpush3.bf16.msra.mxu0 %v5279_v47 }
 0x2d8   : > { %5139 = vmatpush3.bf16.msra.mxu1 %v5590_v33  ;;  %4702 = vmatprep.subr.bf16.mxu0 %v5448_v49 }
 0x2d9   : > { %5141 = vmatprep.subr.bf16.mxu1 %v5588_v32  ;;  %4734 = vmatprep.mubr.msk.f32.mxu1 %vm538_vm3, %v3960_v50 }
 0x2da   : > { %4716 = vmatprep.mubr.msk.bf16.mxu0 %vm5449_vm5, %v5448_v49 }
 0x2db   : > { %4703 = vmatpush3.bf16.msra.mxu0 %v5280_v51 }
 0x2dc   : > { %5143 = vmatpush3.bf16.msra.mxu1 %v5588_v32  ;;  %4704 = vmatprep.subr.bf16.mxu0 %v5448_v49 }
 0x2dd   : > { %5145 = vmatprep.subr.bf16.mxu1 %v5600_v43 }
 0x2df   : > { %4705 = vmatpush3.bf16.msra.mxu0 %v5281_v52 }
 0x2e0   : > { %5147 = vmatpush3.bf16.msra.mxu1 %v5600_v43  ;;  %4706 = vmatprep.subr.bf16.mxu0 %v5448_v49 }
 0x2e1   : > { %4732 = vmatprep.subr.msk.mxu1 %vm545_vm4, %v5602_v44 }
 0x2e3   : > { %4707 = vmatpush3.bf16.msra.mxu0 %v5282_v53 }
 0x2e4   : > { %4733 = vmatpush3.msk.msra.mxu1 %vm545_vm4, %v5602_v44  ;;  %4708 = vmatprep.subr.bf16.mxu0 %v5448_v49 }
 0x2e5   : > { %4735 = vmatmul.mubr.msk.f32.vlgmr.msra.gmra.mrb[10].mxu1 %vm538_vm3, %v3961_v54  ;;  %4737 = vmatprep.subr.bf16.mxu1 %v5448_v49 }
 0x2e6   : > { %4738 = vmatpush3.bf16.msra.mxu1 %v5283_v55  ;;  %4753 = vmatprep.mubr.msk.bf16.mxu1 %vm5449_vm5, %v5448_v49 }
 0x2e7   : > { %4709 = vmatpush3.bf16.msra.mxu0 %v5284_v56  ;;  %4739 = vmatprep.subr.bf16.mxu1 %v5448_v49 }
 0x2e8   : > { %4710 = vmatprep.subr.bf16.mxu0 %v5448_v49 }
 0x2ea   : > { %4740 = vmatpush3.bf16.msra.mxu1 %v5285_v57 }
 0x2eb   : > { %4711 = vmatpush3.bf16.msra.mxu0 %v5286_v58  ;;  %4741 = vmatprep.subr.bf16.mxu1 %v5448_v49  ;;  %v4047_v58 = vld [vmem:[%s6478_s3 + $0x80] sm:$0xff] }
 0x2ec   : > { %4712 = vmatprep.subr.bf16.mxu0 %v5448_v49 }
 0x2ee   : > { %4742 = vmatpush3.bf16.msra.mxu1 %v5287_v59 }
 0x2ef   : > { %4713 = vmatpush3.bf16.msra.mxu0 %v5288_v60  ;;  %4743 = vmatprep.subr.bf16.mxu1 %v5448_v49 }
 0x2f0   : > { %4714 = vmatprep.subr.bf16.mxu0 %v5448_v49 }
 0x2f2   : > { %4744 = vmatpush3.bf16.msra.mxu1 %v5289_v61 }
 0x2f3   : > { %4715 = vmatpush3.bf16.msra.mxu0 %v5290_v62  ;;  %4745 = vmatprep.subr.bf16.mxu1 %v5448_v49 }
 0x2f4   : > { %5149 = vmatprep.subr.bf16.mxu0 %v5590_v33 }
 0x2f6   : > { %4746 = vmatpush3.bf16.msra.mxu1 %v5291_v63  ;;  %v4048_v63 = vld [vmem:[%s6478_s3 + $0x88] sm:$0x1] }
 0x2f7   : > { %4747 = vmatprep.subr.bf16.mxu1 %v5448_v49 }
 0x2fa   : > { %4748 = vmatpush3.bf16.msra.mxu1 %v5292_v0 }
 0x2fb   : > { %4749 = vmatprep.subr.bf16.mxu1 %v5448_v49 }
 0x2fe   : > { %4750 = vmatpush3.bf16.msra.mxu1 %v5293_v1 }
 0x2ff   : > { %4751 = vmatprep.subr.bf16.mxu1 %v5448_v49 }
 0x302   : > { %4752 = vmatpush3.bf16.msra.mxu1 %v5294_v2  ;;  %v5315_v2 = vld [vmem:[%s6479_s4 + $0x220] sm:$0xff]  }
 0x303   : > { %5161 = vmatprep.subr.bf16.mxu1 %v5590_v33 }
 0x39b   : > { %v1105_v3 = vpop.f32.mrb[16].mxu0 }
 0x39c   : > { %v1112_v4 = vadd.f32 %v1105_v3, %v5798_v28  ;;  %v4644_v5 = vpop.f32.mrb[17].mxu0  ;;  %v4019_v28 = vld [vmem:[%s6478_s3 + $0x78] sm:$0x1]  ;;  %v5316_v3 = vld [vmem:[%s6479_s4 + $0x228] sm:$0xff]  }
 0x39d   : > { %v1108_v6 = vpop.f32.mrb[18].mxu0  ;;  %v5318_v5 = vld [vmem:[%s6479_s4 + $0x238] sm:$0xff]  }
 0x39e   : > { %v1113_v7 = vadd.f32 %v1108_v6, %v5800_v35  ;;  %v4645_v8 = vpop.f32.mrb[19].mxu0  ;;  %v5303_v35 = vld [vmem:[%s6479_s4 + $0x1c0] sm:$0xff]  }
 0x3a9   : > { %v4699_v9 = vpop.f32.mrb[10].mxu0 }
 0x3aa   : > { %v1298_v10 = vpop.f32.mrb[12].mxu1  ;;  %v1382_v11 = vpop.f32.mrb[11].mxu0 }
 0x3ab   : > { %v5908_v12 = vadd.f32 %v1298_v10, %v1112_v4  ;;  %v1391_v13 = vpack.c.bf16 %v4699_v9, %v1382_v11  ;;  %v4681_v14 = vpop.f32.mrb[13].mxu1  ;;  %v5317_v4 = vld [vmem:[%s6479_s4 + $0x230] sm:$0xff]  }
 0x3ac   : > { %v1301_v16 = vpop.f32.mrb[14].mxu1 }
 0x3ad   : > { %v5913_v17 = vadd.f32 %v1301_v16, %v1113_v7  ;;  %4717 = vmatmul.mubr.bf16.vlgmr.msra.gmra.mrb[20].mxu0 %v1391_v13  ;;  %v4682_v18 = vpop.f32.mrb[15].mxu1 }
 0x3ae   : > { %5151 = vmatpush3.bf16.msra.mxu0 %v5590_v33  ;;  %4771 = vmatprep.mubr.msk.f32.mxu0 %vm538_vm3, %v3989_v15 }
 0x3af   : > { %5153 = vmatprep.subr.bf16.mxu0 %v5588_v32 }
 0x3b2   : > { %5155 = vmatpush3.bf16.msra.mxu0 %v5588_v32 }
 0x3b3   : > { %5157 = vmatprep.subr.bf16.mxu0 %v5600_v43 }
 0x3b6   : > { %5159 = vmatpush3.bf16.msra.mxu0 %v5600_v43 }
 0x3b7   : > { %4769 = vmatprep.subr.msk.mxu0 %vm545_vm4, %v5602_v44 }
 0x3b8   : > { %v4736_v19 = vpop.f32.mrb[10].mxu1 }
 0x3b9   : > { %v1575_v22 = vpop.f32.mrb[11].mxu1 }
 0x3ba   : > { %v1584_v23 = vpack.c.bf16 %v4736_v19, %v1575_v22  ;;  %4770 = vmatpush3.msk.msra.mxu0 %vm545_vm4, %v5602_v44  ;;  %v5319_v22 = vld [vmem:[%s6482_s7] sm:$0xff]  }
 0x3bb   : > { %4772 = vmatmul.mubr.msk.f32.vlgmr.msra.gmra.mrb[24].mxu0 %vm538_vm3, %v3990_v20  ;;  %4774 = vmatprep.subr.bf16.mxu0 %v5448_v49 }
 0x3bc   : > { %4754 = vmatmul.mubr.bf16.vlgmr.msra.gmra.mrb[16].mxu1 %v1584_v23  ;;  %4775 = vmatpush3.bf16.msra.mxu0 %v5295_v21  ;;  %v5450_v21 = vmov 0.0|0.0   ;;  %v5320_v23 = vld [vmem:[%s6482_s7 + $0x8] sm:$0xff]  }
 0x3bd   : > { %5163 = vmatpush3.bf16.msra.mxu1 %v5590_v33  ;;  %4776 = vmatprep.subr.bf16.mxu0 %v5448_v49 }
 0x3be   : > { %5165 = vmatprep.subr.bf16.mxu1 %v5588_v32  ;;  %4808 = vmatprep.mubr.msk.f32.mxu1 %vm538_vm3, %v4018_v24  ;;  %v5322_v24 = vld [vmem:[%s6482_s7 + $0x10] sm:$0xff]  }
 0x3bf   : > { %4790 = vmatprep.mubr.msk.bf16.mxu0 %vm5449_vm5, %v5448_v49 }
 0x3c0   : > { %4777 = vmatpush3.bf16.msra.mxu0 %v5296_v25  ;;  %v5324_v25 = vld [vmem:[%s6482_s7 + $0x18] sm:$0xff]  }
 0x3c1   : > { %5167 = vmatpush3.bf16.msra.mxu1 %v5588_v32  ;;  %4778 = vmatprep.subr.bf16.mxu0 %v5448_v49 }
 0x3c2   : > { %5169 = vmatprep.subr.bf16.mxu1 %v5600_v43 }
 0x3c4   : > { %4779 = vmatpush3.bf16.msra.mxu0 %v5297_v26  ;;  %v5326_v26 = vld [vmem:[%s6482_s7 + $0x20] sm:$0xff]  }
 0x3c5   : > { %5171 = vmatpush3.bf16.msra.mxu1 %v5600_v43  ;;  %4780 = vmatprep.subr.bf16.mxu0 %v5448_v49 }
 0x3c6   : > { %4806 = vmatprep.subr.msk.mxu1 %vm545_vm4, %v5602_v44 }
 0x3c8   : > { %4781 = vmatpush3.bf16.msra.mxu0 %v5298_v27  ;;  %v5328_v27 = vld [vmem:[%s6482_s7 + $0x28] sm:$0xff]  }
 0x3c9   : > { %4807 = vmatpush3.msk.msra.mxu1 %vm545_vm4, %v5602_v44  ;;  %4782 = vmatprep.subr.bf16.mxu0 %v5448_v49 }
 0x3ca   : > { %4809 = vmatmul.mubr.msk.f32.vlgmr.msra.gmra.mrb[20].mxu1 %vm538_vm3, %v4019_v28  ;;  %4811 = vmatprep.subr.bf16.mxu1 %v5448_v49  ;;  %v5330_v28 = vld [vmem:[%s6482_s7 + $0x30] sm:$0xff]  }
 0x3cb   : > { %4827 = vmatprep.mubr.msk.bf16.mxu1 %vm5449_vm5, %v5448_v49  ;;  %4812 = vmatpush3.bf16.msra.mxu1 %v5303_v35 }
 0x3cc   : > { %4783 = vmatpush3.bf16.msra.mxu0 %v5299_v29  ;;  %4813 = vmatprep.subr.bf16.mxu1 %v5448_v49  ;;  %v5332_v29 = vld [vmem:[%s6482_s7 + $0x38] sm:$0xff]  }
 0x3cd   : > { %4784 = vmatprep.subr.bf16.mxu0 %v5448_v49 }
 0x3cf   : > { %4814 = vmatpush3.bf16.msra.mxu1 %v5304_v36 }
 0x3d0   : > { %4785 = vmatpush3.bf16.msra.mxu0 %v5300_v30  ;;  %4815 = vmatprep.subr.bf16.mxu1 %v5448_v49 }
 0x3d1   : > { %4786 = vmatprep.subr.bf16.mxu0 %v5448_v49 }
 0x3d3   : > { %4816 = vmatpush3.bf16.msra.mxu1 %v5305_v37 }
 0x3d4   : > { %4787 = vmatpush3.bf16.msra.mxu0 %v5301_v31  ;;  %4817 = vmatprep.subr.bf16.mxu1 %v5448_v49  ;;  %v4076_v31 = vld [vmem:[%s6480_s5] ss:$0 sm:$0xff] }
 0x3d5   : > { %4788 = vmatprep.subr.bf16.mxu0 %v5448_v49 }
 0x3d7   : > { %4818 = vmatpush3.bf16.msra.mxu1 %v5306_v38 }
 0x3d8   : > { %4789 = vmatpush3.bf16.msra.mxu0 %v5302_v34  ;;  %4819 = vmatprep.subr.bf16.mxu1 %v5448_v49 }
 0x3d9   : > { %5173 = vmatprep.subr.bf16.mxu0 %v5590_v33 }
 0x3db   : > { %4820 = vmatpush3.bf16.msra.mxu1 %v5307_v39 }
 0x3dc   : > { %4821 = vmatprep.subr.bf16.mxu1 %v5448_v49 }
 0x3df   : > { %4822 = vmatpush3.bf16.msra.mxu1 %v5308_v40 }
 0x3e0   : > { %4823 = vmatprep.subr.bf16.mxu1 %v5448_v49 }
 0x3e3   : > { %4824 = vmatpush3.bf16.msra.mxu1 %v5309_v41 }
 0x3e4   : > { %4825 = vmatprep.subr.bf16.mxu1 %v5448_v49 }
 0x3e7   : > { %4826 = vmatpush3.bf16.msra.mxu1 %v5310_v42 }
 0x3e8   : > { %5184 = vmatprep.subr.bf16.mxu1 %v5450_v21 }
 0x480   : > { %v1491_v45 = vpop.f32.mrb[20].mxu0 }
 0x481   : > { %v1498_v46 = vadd.f32 %v1491_v45, %v5908_v12  ;;  %v4718_v47 = vpop.f32.mrb[21].mxu0 }
 0x482   : > { %v1494_v48 = vpop.f32.mrb[22].mxu0  ;;  %v2283_v47 = vld [vmem:[%s6481_s6] sm:$0xf] }
 0x483   : > { %v1499_v50 = vadd.f32 %v1494_v48, %v5913_v17  ;;  %v4719_v51 = vpop.f32.mrb[23].mxu0  ;;  %v4079_v48 = vld [vmem:[%s6481_s6 + $0x4] sm:$0xf] }
 0x484   : > { %v5323_v51 = vld [vmem:[%s6482_s7 + $0x48] sm:$0xff]  }
 0x48e   : > { %v4773_v52 = vpop.f32.mrb[24].mxu0 }
 0x48f   : > { %v1684_v53 = vpop.f32.mrb[16].mxu1  ;;  %v1768_v54 = vpop.f32.mrb[25].mxu0 }
 0x490   : > { %v1691_v55 = vadd.f32 %v1684_v53, %v1498_v46  ;;  %v1777_v56 = vpack.c.bf16 %v4773_v52, %v1768_v54  ;;  %v4755_v57 = vpop.f32.mrb[17].mxu1  ;;  %v5325_v52 = vld [vmem:[%s6482_s7 + $0x50] sm:$0xff]   ;;  %v5327_v53 = vld [vmem:[%s6482_s7 + $0x58] sm:$0xff]   ;;  %v5329_v54 = vld [vmem:[%s6482_s7 + $0x60] sm:$0xff]  }
 0x491   : > { %v1687_v59 = vpop.f32.mrb[18].mxu1  ;;  %v5334_v57 = vld [vmem:[%s6482_s7 + $0x78] sm:$0xff]  }
 0x492   : > { %v1692_v60 = vadd.f32 %v1687_v59, %v1499_v50  ;;  %4791 = vmatmul.mubr.bf16.vlgmr.msra.gmra.mrb[28].mxu0 %v1777_v56  ;;  %v4756_v61 = vpop.f32.mrb[19].mxu1  ;;  %v5321_v50 = vld [vmem:[%s6482_s7 + $0x40] sm:$0xff]   ;;  %v5333_v56 = vld [vmem:[%s6482_s7 + $0x70] sm:$0xff]  }
 0x493   : > { %5175 = vmatpush3.bf16.msra.mxu0 %v5590_v33  ;;  %4845 = vmatprep.mubr.msk.f32.mxu0 %vm538_vm3, %v4047_v58  ;;  %v5311_v33 = vld [vmem:[%s6479_s4 + $0x200] sm:$0xff]  }
 0x494   : > { %5177 = vmatprep.subr.bf16.mxu0 %v5588_v32 }
 0x497   : > { %5179 = vmatpush3.bf16.msra.mxu0 %v5588_v32  ;;  %v5312_v32 = vld [vmem:[%s6479_s4 + $0x208] sm:$0xff]  }
 0x498   : > { %5181 = vmatprep.subr.bf16.mxu0 %v5600_v43 }
 0x49b   : > { %5183 = vmatpush3.bf16.msra.mxu0 %v5600_v43  ;;  %v5313_v43 = vld [vmem:[%s6479_s4 + $0x210] sm:$0xff]  }
 0x49c   : > { %4843 = vmatprep.subr.msk.mxu0 %vm545_vm4, %v5602_v44 }
 0x49d   : > { %v4810_v62 = vpop.f32.mrb[20].mxu1 }
 0x49e   : > { %v1961_v0 = vpop.f32.mrb[21].mxu1 }
 0x49f   : > { %v1970_v1 = vpack.c.bf16 %v4810_v62, %v1961_v0  ;;  %4844 = vmatpush3.msk.msra.mxu0 %vm545_vm4, %v5602_v44  ;;  %v5314_v44 = vld [vmem:[%s6479_s4 + $0x218] sm:$0xff]   ;;  %v5335_v62 = vld [vmem:[%s6482_s7 + $0x80] sm:$0xff]   ;;  %v4114_v0 = vld [vmem:[%s6481_s6 + $0x8] sm:$0xf] }
 0x4a0   : > { %4846 = vmatmul.mubr.msk.f32.vlgmr.msra.gmra.mrb[26].mxu0 %vm538_vm3, %v4048_v63  ;;  %4848 = vmatprep.subr.bf16.mxu0 %v5448_v49 }
 0x4a1   : > { %4828 = vmatmul.mubr.bf16.vlgmr.msra.gmra.mrb[24].mxu1 %v1970_v1  ;;  %4849 = vmatpush3.bf16.msra.mxu0 %v5311_v33  ;;  %v5336_v1 = vld [vmem:[%s6482_s7 + $0x88] sm:$0xff]  }
 0x4a2   : > { %4850 = vmatprep.subr.bf16.mxu0 %v5448_v49  ;;  %4864 = vmatprep.mubr.msk.bf16.mxu0 %vm5449_vm5, %v5448_v49 }
 0x4a3   : > { %4872 = vmatprep.mubr.msk.f32.mxu1 %vm5449_vm5, %v5448_v49 }
 0x4a5   : > { %4851 = vmatpush3.bf16.msra.mxu0 %v5312_v32  ;;  %v4141_v32 = vld [vmem:[%s6481_s6 + $0xc] sm:$0xf] }
 0x4a6   : > { %4852 = vmatprep.subr.bf16.mxu0 %v5448_v49 }
 0x4a9   : > { %4853 = vmatpush3.bf16.msra.mxu0 %v5313_v43  ;;  %v5337_v43 = vld [vmem:[%s6482_s7 + $0xc0] sm:$0xff]  }
 0x4aa   : > { %4854 = vmatprep.subr.bf16.mxu0 %v5448_v49 }
 0x4ad   : > { %4855 = vmatpush3.bf16.msra.mxu0 %v5314_v44  ;;  %v5338_v44 = vld [vmem:[%s6482_s7 + $0x90] sm:$0xff]  }
 0x4ae   : > { %4856 = vmatprep.subr.bf16.mxu0 %v5448_v49 }
 0x4b1   : > { %4857 = vmatpush3.bf16.msra.mxu0 %v5315_v2  ;;  %v5339_v2 = vld [vmem:[%s6482_s7 + $0xc8] sm:$0xff]  }
 0x4b2   : > { %4858 = vmatprep.subr.bf16.mxu0 %v5448_v49 }
 0x4b5   : > { %4859 = vmatpush3.bf16.msra.mxu0 %v5316_v3  ;;  %v5340_v3 = vld [vmem:[%s6482_s7 + $0x98] sm:$0xff]  }
 0x4b6   : > { %4860 = vmatprep.subr.bf16.mxu0 %v5448_v49 }
 0x4b9   : > { %4861 = vmatpush3.bf16.msra.mxu0 %v5317_v4  ;;  %v5341_v4 = vld [vmem:[%s6482_s7 + $0xd0] sm:$0xff]  }
 0x4ba   : > { %4862 = vmatprep.subr.bf16.mxu0 %v5448_v49 }
 0x4bd   : > { %4863 = vmatpush3.bf16.msra.mxu0 %v5318_v5  ;;  %v5342_v5 = vld [vmem:[%s6482_s7 + $0xa0] sm:$0xff]  }
 0x4be   : > { %4902 = vmatprep.subr.bf16.mxu0 %v5448_v49 }
 0x565   : > { %v1877_v6 = vpop.f32.mrb[28].mxu0 }
 0x566   : > { %v1884_v7 = vadd.f32 %v1877_v6, %v1691_v55  ;;  %v4792_v8 = vpop.f32.mrb[29].mxu0  ;;  %v5331_v55 = vld [vmem:[%s6482_s7 + $0x68] sm:$0xff]   ;;  %v5343_v6 = vld [vmem:[%s6482_s7 + $0xd8] sm:$0xff]  }
 0x567   : > { %v1880_v9 = vpop.f32.mrb[30].mxu0  ;;  %v5345_v8 = vld [vmem:[%s6482_s7 + $0xe0] sm:$0xff]  }
 0x568   : > { %v1885_v10 = vadd.f32 %v1880_v9, %v1692_v60  ;;  %v4793_v11 = vpop.f32.mrb[31].mxu0  ;;  %v5346_v9 = vld [vmem:[%s6482_s7 + $0xb0] sm:$0xff]  }
 0x569   : > { %v5348_v11 = vld [vmem:[%s6482_s7 + $0xb8] sm:$0xff]  }
 0x573   : > { %v4847_v12 = vpop.f32.mrb[26].mxu0 }
 0x574   : > { %v2070_v13 = vpop.f32.mrb[24].mxu1  ;;  %v2154_v14 = vpop.f32.mrb[27].mxu0 }
 0x575   : > { %v2077_v15 = vadd.f32 %v2070_v13, %v1884_v7  ;;  %v2163_v16 = vpack.c.bf16 %v4847_v12, %v2154_v14  ;;  %v4829_v17 = vpop.f32.mrb[25].mxu1  ;;  %v5344_v7 = vld [vmem:[%s6482_s7 + $0xa8] sm:$0xff]   ;;  %v5349_v12 = vld [vmem:[%s6482_s7 + $0xf0] sm:$0xff]   ;;  %v5350_v13 = vld [vmem:[%s6482_s7 + $0xf8] sm:$0xff]  }
 0x576   : > { %v2073_v18 = vpop.f32.mrb[26].mxu1 }
 0x577   : > { %v2078_v19 = vadd.f32 %v2073_v18, %v1885_v10  ;;  %4865 = vmatmul.mubr.bf16.vlgmr.msra.gmra.mrb[32].mxu0 %v2163_v16  ;;  %v4830_v20 = vpop.f32.mrb[27].mxu1  ;;  %v5347_v10 = vld [vmem:[%s6482_s7 + $0xe8] sm:$0xff]  }
 0x578   : > { %4918 = vmatprep.mubr.msk.bf16.mxu0 %vm5449_vm5, %v5448_v49  ;;  %4903 = vmatpush3.bf16.msra.mxu0 %v5319_v22 }
 0x579   : > { %4904 = vmatprep.subr.bf16.mxu0 %v5448_v49 }
 0x57c   : > { %4905 = vmatpush3.bf16.msra.mxu0 %v5320_v23 }
 0x57d   : > { %4906 = vmatprep.subr.bf16.mxu0 %v5448_v49 }
 0x580   : > { %4907 = vmatpush3.bf16.msra.mxu0 %v5322_v24 }
 0x581   : > { %4908 = vmatprep.subr.bf16.mxu0 %v5448_v49 }
 0x584   : > { %4909 = vmatpush3.bf16.msra.mxu0 %v5324_v25 }
 0x585   : > { %4910 = vmatprep.subr.bf16.mxu0 %v5448_v49 }
 0x588   : > { %4911 = vmatpush3.bf16.msra.mxu0 %v5326_v26 }
 0x589   : > { %4912 = vmatprep.subr.bf16.mxu0 %v5448_v49 }
 0x58c   : > { %4913 = vmatpush3.bf16.msra.mxu0 %v5328_v27 }
 0x58d   : > { %4914 = vmatprep.subr.bf16.mxu0 %v5448_v49 }
 0x590   : > { %4915 = vmatpush3.bf16.msra.mxu0 %v5330_v28 }
 0x591   : > { %4916 = vmatprep.subr.bf16.mxu0 %v5448_v49 }
 0x594   : > { %4917 = vmatpush3.bf16.msra.mxu0 %v5332_v29  ;;  %v5352_v29 = vld [vmem:[%s6485_s10] sm:$0xff]  }
 0x595   : > { %5192 = vmatprep.subr.bf16.mxu0 %v5450_v21 }
 0x64a   : > { %v2263_v30 = vpop.f32.mrb[32].mxu0 }
 0x64b   : > { %v2270_v34 = vadd.f32 %v2263_v30, %v2077_v15  ;;  %v4866_v35 = vpop.f32.mrb[33].mxu0  ;;  %v5354_v30 = vld [vmem:[%s6485_s10 + $0x8] sm:$0xff]  }
 0x64c   : > { %v2266_v36 = vpop.f32.mrb[34].mxu0  ;;  %v5360_v35 = vld [vmem:[%s6485_s10 + $0x20] sm:$0xff]  }
 0x64d   : > { %v2279_v37 = vadd.f32 %v4076_v31, %v2270_v34  ;;  %v2271_v38 = vadd.f32 %v2266_v36, %v2078_v19  ;;  %v4867_v39 = vpop.f32.mrb[35].mxu0  ;;  %v5358_v34 = vld [vmem:[%s6485_s10 + $0x18] sm:$0xff]   ;;  %v5362_v36 = vld [vmem:[%s6485_s10 + $0x28] sm:$0xff]  }
 0x64f   : > { %v2280_v40 = vadd.f32 %v4076_v31, %v2271_v38  ;;  %v2281_v41 = vmax.f32 %v2279_v37, 0.0  ;;  %v5356_v31 = vld [vmem:[%s6485_s10 + $0x10] sm:$0xff]  }
 0x650   : > { %v5364_v37 = vld [vmem:[%s6485_s10 + $0x30] sm:$0xff]  }
 0x651   : > { %v2282_v42 = vmax.f32 %v2280_v40, 0.0 }
 0x653   : > { %v5185_v46 = vpack.c.bf16 %v2282_v42, %v2281_v41 }
 0x655   : > { %5187 = vmatpush3.bf16.msk.msra.mxu1 %vm6110_vm7, %v5185_v46 }
 0x656   : > { %5188 = vmatprep.subr.bf16.mxu1 %v5450_v21 }
 0x658   : > { %4873 = vmatmul.mubr.msk.f32.vlgmr.msra.gmra.mrb[22].mxu1 %vm2284_vm8, %v2283_v47 }
 0x659   : > { %5191 = vmatpush3.bf16.msk.msra.mxu1 %vm6110_vm7, %v5185_v46  ;;  %4879 = vmatprep.mubr.msk.f32.mxu1 %vm5449_vm5, %v5448_v49 }
 0x65a   : > { %4882 = vmatprep.subr.bf16.mxu1 %v5448_v49 }
 0x65c   : > { %4880 = vmatmul.mubr.msk.f32.vlgmr.msra.gmra.mrb[28].mxu1 %vm2284_vm8, %v4079_v48 }
 0x65d   : > { %4883 = vmatpush3.bf16.msra.mxu1 %v5321_v50  ;;  %4898 = vmatprep.mubr.msk.bf16.mxu1 %vm5449_vm5, %v5448_v49 }
 0x65e   : > { %4884 = vmatprep.subr.bf16.mxu1 %v5448_v49 }
 0x661   : > { %4885 = vmatpush3.bf16.msra.mxu1 %v5323_v51 }
 0x662   : > { %4886 = vmatprep.subr.bf16.mxu1 %v5448_v49 }
 0x665   : > { %4887 = vmatpush3.bf16.msra.mxu1 %v5325_v52 }
 0x666   : > { %4888 = vmatprep.subr.bf16.mxu1 %v5448_v49 }
 0x669   : > { %4889 = vmatpush3.bf16.msra.mxu1 %v5327_v53 }
 0x66a   : > { %4890 = vmatprep.subr.bf16.mxu1 %v5448_v49 }
 0x66d   : > { %4891 = vmatpush3.bf16.msra.mxu1 %v5329_v54  ;;  %v3020_v54 = vld [vmem:[%s6484_s9] sm:$0x1] }
 0x66e   : > { %4892 = vmatprep.subr.bf16.mxu1 %v5448_v49 }
 0x671   : > { %4893 = vmatpush3.bf16.msra.mxu1 %v5331_v55  ;;  %v4171_v55 = vld [vmem:[%s6484_s9 + $0x1] sm:$0x1] }
 0x672   : > { %4894 = vmatprep.subr.bf16.mxu1 %v5448_v49 }
 0x675   : > { %4895 = vmatpush3.bf16.msra.mxu1 %v5333_v56  ;;  %v5351_v56 = vld [vmem:[%s6485_s10 + $0x40] sm:$0xff]  }
 0x676   : > { %4896 = vmatprep.subr.bf16.mxu1 %v5448_v49 }
 0x679   : > { %4897 = vmatpush3.bf16.msra.mxu1 %v5334_v57  ;;  %v5353_v57 = vld [vmem:[%s6485_s10 + $0x48] sm:$0xff]  }
 0x67a   : > { %4929 = vmatprep.subr.bf16.mxu1 %v5448_v49 }
 0x72b   : > { %v2357_v58 = vpop.f32.mrb[22].mxu1 }
 0x72c   : > { %v2361_v59 = vpack.c.bf16 %v2357_v58, %v2357_v58  ;;  %v4874_v60 = vpop.f32.mrb[23].mxu1  ;;  %v5355_v58 = vld [vmem:[%s6485_s10 + $0x50] sm:$0xff]  }
 0x72d   : > { %v5359_v60 = vld [vmem:[%s6485_s10 + $0x60] sm:$0xff]  }
 0x72e   : > { %4919 = vmatmul.mubr.bf16.vlgmr.msra.gmra.mrb[36].mxu0 %v2361_v59  ;;  %v5357_v59 = vld [vmem:[%s6485_s10 + $0x58] sm:$0xff]  }
 0x72f   : > { %5195 = vmatpush3.bf16.msk.msra.mxu0 %vm6110_vm7, %v5185_v46  ;;  %v2449_v61 = vpop.f32.mrb[28].mxu1  ;;  %4926 = vmatprep.mubr.msk.f32.mxu0 %vm5449_vm5, %v5448_v49 }
 0x730   : > { %v2453_v63 = vpack.c.bf16 %v2449_v61, %v2449_v61  ;;  %5196 = vmatprep.subr.bf16.mxu0 %v5450_v21  ;;  %v4881_v33 = vpop.f32.mrb[29].mxu1  ;;  %v5361_v61 = vld [vmem:[%s6485_s10 + $0x68] sm:$0xff]  }
 0x731   : > { %v5365_v33 = vld [vmem:[%s6485_s10 + $0x78] sm:$0xff]  }
 0x732   : > { %4899 = vmatmul.mubr.bf16.vlgmr.msra.gmra.mrb[32].mxu1 %v2453_v63  ;;  %v5366_v63 = vld [vmem:[%s6485_s10 + $0x38] sm:$0xff]  }
 0x733   : > { %4930 = vmatpush3.bf16.msra.mxu1 %v5335_v62  ;;  %4945 = vmatprep.mubr.msk.bf16.mxu1 %vm5449_vm5, %v5448_v49  ;;  %v5363_v62 = vld [vmem:[%s6485_s10 + $0x70] sm:$0xff]  }
 0x734   : > { %4931 = vmatprep.subr.bf16.mxu1 %v5448_v49 }
 0x736   : > { %4927 = vmatmul.mubr.msk.f32.vlgmr.msra.gmra.mrb[40].mxu0 %vm2284_vm8, %v4114_v0 }
 0x737   : > { %5199 = vmatpush3.bf16.msk.msra.mxu0 %vm6110_vm7, %v5185_v46  ;;  %4953 = vmatprep.mubr.msk.f32.mxu0 %vm5449_vm5, %v5448_v49  ;;  %v4168_v46 = vld [vmem:[%s6483_s8] ss:$0 sm:$0xff] }
 0x738   : > { %4956 = vmatprep.subr.bf16.mxu0 %v5448_v49  ;;  %4932 = vmatpush3.bf16.msra.mxu1 %v5336_v1  ;;  %v5367_v1 = vld [vmem:[%s6485_s10 + $0x80] sm:$0xff]  }
 0x739   : > { %4933 = vmatprep.subr.bf16.mxu1 %v5448_v49 }
 0x73a   : > { %4954 = vmatmul.mubr.msk.f32.vlgmr.msra.gmra.mrb[42].mxu0 %vm2284_vm8, %v4141_v32 }
 0x73b   : > { %4957 = vmatpush3.bf16.msra.mxu0 %v5337_v43  ;;  %4972 = vmatprep.mubr.msk.bf16.mxu0 %vm5449_vm5, %v5448_v49 }
 0x73c   : > { %4958 = vmatprep.subr.bf16.mxu0 %v5448_v49  ;;  %4934 = vmatpush3.bf16.msra.mxu1 %v5338_v44 }
 0x73d   : > { %4935 = vmatprep.subr.bf16.mxu1 %v5448_v49 }
 0x73f   : > { %4959 = vmatpush3.bf16.msra.mxu0 %v5339_v2 }
 0x740   : > { %4960 = vmatprep.subr.bf16.mxu0 %v5448_v49  ;;  %4936 = vmatpush3.bf16.msra.mxu1 %v5340_v3 }
 0x741   : > { %4937 = vmatprep.subr.bf16.mxu1 %v5448_v49 }
 0x743   : > { %4961 = vmatpush3.bf16.msra.mxu0 %v5341_v4  ;;  %v5368_v4 = vld [vmem:[%s6485_s10 + $0x88] sm:$0xff]  }
 0x744   : > { %4962 = vmatprep.subr.bf16.mxu0 %v5448_v49  ;;  %4938 = vmatpush3.bf16.msra.mxu1 %v5342_v5  ;;  %v5370_v5 = vld [vmem:[%s6485_s10 + $0x90] sm:$0xff]  }
 0x745   : > { %4939 = vmatprep.subr.bf16.mxu1 %v5448_v49 }
 0x747   : > { %4963 = vmatpush3.bf16.msra.mxu0 %v5343_v6  ;;  %v4206_v6 = vld [vmem:[%s6484_s9 + $0x2] sm:$0x1] }
 0x748   : > { %4964 = vmatprep.subr.bf16.mxu0 %v5448_v49  ;;  %4940 = vmatpush3.bf16.msra.mxu1 %v5344_v7  ;;  %v5372_v7 = vld [vmem:[%s6485_s10 + $0x98] sm:$0xff]  }
 0x749   : > { %4941 = vmatprep.subr.bf16.mxu1 %v5448_v49 }
 0x74b   : > { %4965 = vmatpush3.bf16.msra.mxu0 %v5345_v8  ;;  %v4233_v8 = vld [vmem:[%s6484_s9 + $0x3] sm:$0x1] }
 0x74c   : > { %4966 = vmatprep.subr.bf16.mxu0 %v5448_v49  ;;  %4942 = vmatpush3.bf16.msra.mxu1 %v5346_v9  ;;  %v5369_v9 = vld [vmem:[%s6485_s10 + $0xc0] sm:$0xff]  }
 0x74d   : > { %4943 = vmatprep.subr.bf16.mxu1 %v5448_v49 }
 0x74f   : > { %4967 = vmatpush3.bf16.msra.mxu0 %v5347_v10  ;;  %v5374_v10 = vld [vmem:[%s6485_s10 + $0xa0] sm:$0xff]  }
 0x750   : > { %4968 = vmatprep.subr.bf16.mxu0 %v5448_v49  ;;  %4944 = vmatpush3.bf16.msra.mxu1 %v5348_v11  ;;  %v5371_v11 = vld [vmem:[%s6485_s10 + $0xc8] sm:$0xff]  }
 0x751   : > { %4976 = vmatprep.subr.mxu1 %v5448_v49 }
 0x753   : > { %4969 = vmatpush3.bf16.msra.mxu0 %v5349_v12  ;;  %v5373_v12 = vld [vmem:[%s6485_s10 + $0xd0] sm:$0xff]  }
 0x754   : > { %4970 = vmatprep.subr.bf16.mxu0 %v5448_v49 }
 0x757   : > { %4971 = vmatpush3.bf16.msra.mxu0 %v5350_v13  ;;  %v5375_v13 = vld [vmem:[%s6485_s10 + $0xd8] sm:$0xff]  }
 0x758   : > { %5006 = vmatprep.subr.bf16.mxu0 %v5448_v49 }
 0x801   : > { %v2641_v14 = vpop.f32.mrb[36].mxu0 }
 0x802   : > { %v4920_v15 = vpop.f32.mrb[37].mxu0 }
 0x803   : > { %v2644_v16 = vpop.f32.mrb[38].mxu0  ;;  %v5377_v15 = vld [vmem:[%s6485_s10 + $0xe0] sm:$0xff]  }
 0x804   : > { %v4921_v17 = vpop.f32.mrb[39].mxu0  ;;  %v5378_v16 = vld [vmem:[%s6485_s10 + $0xb0] sm:$0xff]  }
 0x805   : > { %v2553_v18 = vpop.f32.mrb[32].mxu1  ;;  %v5379_v17 = vld [vmem:[%s6485_s10 + $0xe8] sm:$0xff]  }
 0x806   : > { %v2642_v19 = vadd.f32 %v2641_v14, %v2553_v18  ;;  %v4900_v20 = vpop.f32.mrb[33].mxu1  ;;  %v5376_v14 = vld [vmem:[%s6485_s10 + $0xa8] sm:$0xff]   ;;  %v5380_v18 = vld [vmem:[%s6485_s10 + $0xb8] sm:$0xff]  }
 0x807   : > { %v2556_v21 = vpop.f32.mrb[34].mxu1  ;;  %v5382_v20 = vld [vmem:[%s6485_s10 + $0xf8] sm:$0xff]  }
 0x808   : > { %v4901_v22 = vpop.f32.mrb[35].mxu1 }
 0x809   : > { %v2718_v23 = vpop.f32.mrb[40].mxu0 }
 0x80a   : > { %v2722_v24 = vpack.c.bf16 %v2718_v23, %v2718_v23  ;;  %v4928_v25 = vpop.f32.mrb[41].mxu0 }
 0x80c   : > { %4946 = vmatmul.mubr.bf16.vlgmr.msra.gmra.mrb[36].mxu1 %v2722_v24 }
 0x80d   : > { %v2900_v26 = vpop.f32.mrb[42].mxu0  ;;  %4978 = vmatprep.mubr.msk.f32.mxu1 %vm5449_vm5, %v5448_v49 }
 0x80e   : > { %v2904_v27 = vpack.c.bf16 %v2900_v26, %v2900_v26  ;;  %v4955_v28 = vpop.f32.mrb[43].mxu0 }
 0x810   : > { %4973 = vmatmul.mubr.bf16.vlgmr.msra.gmra.mrb[44].mxu0 %v2904_v27 }
 0x811   : > { %5022 = vmatprep.mubr.msk.bf16.mxu0 %vm5449_vm5, %v5448_v49  ;;  %5007 = vmatpush3.bf16.msra.mxu0 %v5352_v29 }
 0x812   : > { %5008 = vmatprep.subr.bf16.mxu0 %v5448_v49 }
 0x815   : > { %5009 = vmatpush3.bf16.msra.mxu0 %v5354_v30 }
 0x816   : > { %5010 = vmatprep.subr.bf16.mxu0 %v5448_v49 }
 0x819   : > { %5011 = vmatpush3.bf16.msra.mxu0 %v5356_v31 }
 0x81a   : > { %5012 = vmatprep.subr.bf16.mxu0 %v5448_v49 }
 0x81d   : > { %5013 = vmatpush3.bf16.msra.mxu0 %v5358_v34 }
 0x81e   : > { %5014 = vmatprep.subr.bf16.mxu0 %v5448_v49 }
 0x821   : > { %5015 = vmatpush3.bf16.msra.mxu0 %v5360_v35 }
 0x822   : > { %5016 = vmatprep.subr.bf16.mxu0 %v5448_v49 }
 0x825   : > { %5017 = vmatpush3.bf16.msra.mxu0 %v5362_v36 }
 0x826   : > { %5018 = vmatprep.subr.bf16.mxu0 %v5448_v49 }
 0x829   : > { %5019 = vmatpush3.bf16.msra.mxu0 %v5364_v37 }
 0x82a   : > { %5020 = vmatprep.subr.bf16.mxu0 %v5448_v49 }
 0x82d   : > { %5021 = vmatpush3.bf16.msra.mxu0 %v5366_v63 }
 0x82e   : > { %5031 = vmatprep.subr.bf16.mxu0 %v5448_v49 }
 0x8df   : > { %v2822_v38 = vpop.f32.mrb[36].mxu1 }
 0x8e0   : > { %v2828_v39 = vadd.f32 %v2822_v38, %v2642_v19  ;;  %v4947_v40 = vpop.f32.mrb[37].mxu1  ;;  %v5381_v19 = vld [vmem:[%s6485_s10 + $0xf0] sm:$0xff]  }
 0x8e1   : > { %v2825_v41 = vpop.f32.mrb[38].mxu1 }
 0x8e2   : > { %v4948_v42 = vpop.f32.mrb[39].mxu1 }
 0x8e3   : > { %v3004_v45 = vpop.f32.mrb[44].mxu0 }
 0x8e4   : > { %v3010_v47 = vadd.f32 %v3004_v45, %v2828_v39  ;;  %v4974_v48 = vpop.f32.mrb[45].mxu0  ;;  %v3749_v45 = vld [vmem:[%s6486_s11] sm:$0x1] }
 0x8e5   : > { %v3007_v50 = vpop.f32.mrb[46].mxu0 }
 0x8e6   : > { %v3018_v51 = vadd.f32 %v4168_v46, %v3010_v47  ;;  %v4975_v52 = vpop.f32.mrb[47].mxu0 }
 0x8e8   : > { %v6285_v53 = vmax.f32 %v3018_v51, 0.0 }
 0x8ea   : > { %4977 = vmatpush3.msk.msra.mxu1 %vm3025_vm9, %v6285_v53 }
 0x8eb   : > { %4979 = vmatmul.mubr.msk.f32.vlgmr.msra.gmra.mrb[30].mxu1 %vm3021_vm10, %v3020_v54  ;;  %4981 = vmatprep.subr.mxu1 %v5448_v49 }
 0x8ec   : > { %4982 = vmatpush3.msk.msra.mxu1 %vm3025_vm9, %v6285_v53  ;;  %4983 = vmatprep.mubr.msk.f32.mxu1 %vm5449_vm5, %v5448_v49 }
 0x8ed   : > { %4986 = vmatprep.subr.bf16.mxu1 %v5448_v49 }
 0x8ef   : > { %4984 = vmatmul.mubr.msk.f32.vlgmr.msra.gmra.mrb[40].mxu1 %vm3021_vm10, %v4171_v55 }
 0x8f0   : > { %4987 = vmatpush3.bf16.msra.mxu1 %v5351_v56  ;;  %5002 = vmatprep.mubr.msk.bf16.mxu1 %vm5449_vm5, %v5448_v49 }
 0x8f1   : > { %4988 = vmatprep.subr.bf16.mxu1 %v5448_v49 }
 0x8f4   : > { %4989 = vmatpush3.bf16.msra.mxu1 %v5353_v57 }
 0x8f5   : > { %4990 = vmatprep.subr.bf16.mxu1 %v5448_v49 }
 0x8f8   : > { %4991 = vmatpush3.bf16.msra.mxu1 %v5355_v58 }
 0x8f9   : > { %4992 = vmatprep.subr.bf16.mxu1 %v5448_v49 }
 0x8fc   : > { %4993 = vmatpush3.bf16.msra.mxu1 %v5357_v59 }
 0x8fd   : > { %4994 = vmatprep.subr.bf16.mxu1 %v5448_v49 }
 0x900   : > { %4995 = vmatpush3.bf16.msra.mxu1 %v5359_v60 }
 0x901   : > { %4996 = vmatprep.subr.bf16.mxu1 %v5448_v49 }
 0x904   : > { %4997 = vmatpush3.bf16.msra.mxu1 %v5361_v61 }
 0x905   : > { %4998 = vmatprep.subr.bf16.mxu1 %v5448_v49 }
 0x908   : > { %4999 = vmatpush3.bf16.msra.mxu1 %v5363_v62 }
 0x909   : > { %5000 = vmatprep.subr.bf16.mxu1 %v5448_v49 }
 0x90c   : > { %5001 = vmatpush3.bf16.msra.mxu1 %v5365_v33 }
 0x90d   : > { %5026 = vmatprep.subr.mxu1 %v5448_v49 }
 0x9be   : > { %v3095_v0 = vpop.f32.mrb[30].mxu1 }
 0x9bf   : > { %v3099_v32 = vpack.c.bf16 %v3095_v0, %v3095_v0  ;;  %v4980_v43 = vpop.f32.mrb[31].mxu1 }
 0x9c1   : > { %5023 = vmatmul.mubr.bf16.vlgmr.msra.gmra.mrb[48].mxu0 %v3099_v32 }
 0x9c2   : > { %v3187_v44 = vpop.f32.mrb[40].mxu1  ;;  %5032 = vmatpush3.bf16.msra.mxu0 %v5367_v1  ;;  %5047 = vmatprep.mubr.msk.bf16.mxu0 %vm5449_vm5, %v5448_v49 }
 0x9c3   : > { %v3191_v2 = vpack.c.bf16 %v3187_v44, %v3187_v44  ;;  %v4985_v3 = vpop.f32.mrb[41].mxu1  ;;  %5033 = vmatprep.subr.bf16.mxu0 %v5448_v49 }
 0x9c5   : > { %5003 = vmatmul.mubr.bf16.vlgmr.msra.gmra.mrb[44].mxu1 %v3191_v2 }
 0x9c6   : > { %5027 = vmatpush3.msk.msra.mxu1 %vm3025_vm9, %v6285_v53  ;;  %5028 = vmatprep.mubr.msk.f32.mxu1 %vm5449_vm5, %v5448_v49 }
 0x9c7   : > { %5051 = vmatprep.subr.mxu1 %v5448_v49  ;;  %5034 = vmatpush3.bf16.msra.mxu0 %v5368_v4 }
 0x9c8   : > { %5035 = vmatprep.subr.bf16.mxu0 %v5448_v49 }
 0x9cb   : > { %5036 = vmatpush3.bf16.msra.mxu0 %v5370_v5 }
 0x9cc   : > { %5037 = vmatprep.subr.bf16.mxu0 %v5448_v49 }
 0x9cd   : > { %5029 = vmatmul.mubr.msk.f32.vlgmr.msra.gmra.mrb[42].mxu1 %vm3021_vm10, %v4206_v6 }
 0x9ce   : > { %5052 = vmatpush3.msk.msra.mxu1 %vm3025_vm9, %v6285_v53  ;;  %5053 = vmatprep.mubr.msk.f32.mxu1 %vm5449_vm5, %v5448_v49 }
 0x9cf   : > { %5056 = vmatprep.subr.bf16.mxu1 %v5448_v49  ;;  %5038 = vmatpush3.bf16.msra.mxu0 %v5372_v7 }
 0x9d0   : > { %5039 = vmatprep.subr.bf16.mxu0 %v5448_v49 }
 0x9d1   : > { %5054 = vmatmul.mubr.msk.f32.vlgmr.msra.gmra.mrb[48].mxu1 %vm3021_vm10, %v4233_v8 }
 0x9d2   : > { %5057 = vmatpush3.bf16.msra.mxu1 %v5369_v9  ;;  %5072 = vmatprep.mubr.msk.bf16.mxu1 %vm5449_vm5, %v5448_v49 }
 0x9d3   : > { %5058 = vmatprep.subr.bf16.mxu1 %v5448_v49  ;;  %5040 = vmatpush3.bf16.msra.mxu0 %v5374_v10 }
 0x9d4   : > { %5041 = vmatprep.subr.bf16.mxu0 %v5448_v49 }
 0x9d6   : > { %5059 = vmatpush3.bf16.msra.mxu1 %v5371_v11 }
 0x9d7   : > { %5060 = vmatprep.subr.bf16.mxu1 %v5448_v49  ;;  %5042 = vmatpush3.bf16.msra.mxu0 %v5376_v14 }
 0x9d8   : > { %5043 = vmatprep.subr.bf16.mxu0 %v5448_v49 }
 0x9da   : > { %5061 = vmatpush3.bf16.msra.mxu1 %v5373_v12 }
 0x9db   : > { %5062 = vmatprep.subr.bf16.mxu1 %v5448_v49  ;;  %5044 = vmatpush3.bf16.msra.mxu0 %v5378_v16 }
 0x9dc   : > { %5045 = vmatprep.subr.bf16.mxu0 %v5448_v49 }
 0x9de   : > { %5063 = vmatpush3.bf16.msra.mxu1 %v5375_v13 }
 0x9df   : > { %5064 = vmatprep.subr.bf16.mxu1 %v5448_v49  ;;  %5046 = vmatpush3.bf16.msra.mxu0 %v5380_v18 }
 0x9e2   : > { %5065 = vmatpush3.bf16.msra.mxu1 %v5377_v15 }
 0x9e3   : > { %5066 = vmatprep.subr.bf16.mxu1 %v5448_v49 }
 0x9e6   : > { %5067 = vmatpush3.bf16.msra.mxu1 %v5379_v17 }
 0x9e7   : > { %5068 = vmatprep.subr.bf16.mxu1 %v5448_v49 }
 0x9ea   : > { %5069 = vmatpush3.bf16.msra.mxu1 %v5381_v19 }
 0x9eb   : > { %5070 = vmatprep.subr.bf16.mxu1 %v5448_v49 }
 0x9ee   : > { %5071 = vmatpush3.bf16.msra.mxu1 %v5382_v20 }
 0xa94   : > { %v3379_v21 = vpop.f32.mrb[48].mxu0 }
 0xa95   : > { %v5024_v22 = vpop.f32.mrb[49].mxu0 }
 0xa96   : > { %v3382_v23 = vpop.f32.mrb[50].mxu0 }
 0xa97   : > { %v5025_v24 = vpop.f32.mrb[51].mxu0 }
 0xa98   : > { %v3291_v25 = vpop.f32.mrb[44].mxu1 }
 0xa99   : > { %v3380_v26 = vadd.f32 %v3379_v21, %v3291_v25  ;;  %v5004_v27 = vpop.f32.mrb[45].mxu1 }
 0xa9a   : > { %v3294_v28 = vpop.f32.mrb[46].mxu1 }
 0xa9b   : > { %v5005_v29 = vpop.f32.mrb[47].mxu1 }
 0xaa0   : > { %v3456_v30 = vpop.f32.mrb[42].mxu1 }
 0xaa1   : > { %v3460_v31 = vpack.c.bf16 %v3456_v30, %v3456_v30  ;;  %v5030_v34 = vpop.f32.mrb[43].mxu1 }
 0xaa3   : > { %5048 = vmatmul.mubr.bf16.vlgmr.msra.gmra.mrb[52].mxu0 %v3460_v31 }
 0xaa4   : > { %v3638_v49 = vpop.f32.mrb[48].mxu1 }
 0xaa5   : > { %v3642_v35 = vpack.c.bf16 %v3638_v49, %v3638_v49  ;;  %v5055_v36 = vpop.f32.mrb[49].mxu1 }
 0xaa7   : > { %5073 = vmatmul.mubr.bf16.vlgmr.msra.gmra.mrb[52].mxu1 %v3642_v35 }
 0xb76   : > { %v3560_v37 = vpop.f32.mrb[52].mxu0 }
 0xb77   : > { %v3566_v38 = vadd.f32 %v3560_v37, %v3380_v26  ;;  %v5049_v39 = vpop.f32.mrb[53].mxu0 }
 0xb78   : > { %v3563_v40 = vpop.f32.mrb[54].mxu0 }
 0xb79   : > { %v5050_v41 = vpop.f32.mrb[55].mxu0 }
 0xb7a   : > { %v3742_v42 = vpop.f32.mrb[52].mxu1 }
 0xb7b   : > { %v3748_v46 = vadd.f32 %v3742_v42, %v3566_v38  ;;  %v5074_v47 = vpop.f32.mrb[53].mxu1 }
 0xb7c   : > { %v3745_v48 = vpop.f32.mrb[54].mxu1 }
 0xb7d   : > { %v3750_v50 = vadd.f32 %v3749_v45, %v3748_v46  ;;  %v5075_v51 = vpop.f32.mrb[55].mxu1 }
 0xb7f   : > { %3752 = vst.msk [vmem:[%s405_s16] sm:$0x1] %vm3751_vm11, %v3750_v50 }
 0xb80   : > { %5396 = shalt.err (!%p5393_p3)
}
 0xb81   : > { %s5397_s26 = scalar_lea.hbm %s6433_s20, 16  ;;  %s5401_s18 = scalar_lea.hbm %s6487_s12, 32 }
 0xb82   : > { %p5398_p4 = scmp.ne.s32.totalorder %s6433_s20, %s5397_s26  ;;  %p5402_p9 = scmp.lt.u32.totalorder %s6433_s20, %s6487_s12 }
 0xb83   : > { %p5403_p10 = scmp.lt.u32.totalorder %s5401_s18, %s5397_s26  ;;  %p5405_p12 = scmp.lt.u32.totalorder %s5397_s26, %s6433_s20 }
 0xb84   : > { %p5399_p7 = pnand %p5398_p4, %p5556_p5 }
 0xb85   : > { %p5404_p11 = por %p5403_p10, %p5402_p9 }
 0xb86   : > { %p5400_p8 = pneg %p5399_p7 }
 0xb87   : > { %p5406_p13 = por %p5405_p12, %p5404_p11 }
 0xb89   : > { %p5407_p0 = pnand %p5406_p13, %p5400_p8 }
 0xb8b   : > { %5410 = shalt.err (!%p5407_p0)
}
 0xb8c   : > { %5201 = dma.vmem_to_hbm [thread:$0]  (%p5556_p5), %s6435_s17, 16, %s6433_s20, %s3754_s25  }
 0xb8d PF: > { %p5207_p1 = scmp.ge.s32.totalorder %s5445_s24, 2  ;;  %s3778_s1 = sand.u32 1, %s5433_s21  }
 0xb8e   : > { %s3779_s28 = scalar_lea.sflag [#allocation3], %s3778_s1 }
 0xb8f   : > { %p5204_p2 = pnand %p5207_p1, %p5560_p6 }
 0xb91   : > { %5428 = dma.done.wait (!%p5204_p2), %s3779_s28, 16  }
 0xb92   : > { %5430 = vsyncadd (!%p5204_p2), %s3779_s28, 4294967280  ;;  %p22_p3 = scmp.ge.s32.totalorder %s5543_s27, 4   ;;  %s6496_s21 = smov %s5437_s22 }
 0xb93   : > { %s6497_s22 = smov %s5441_s23  ;;  %s6498_s23 = smov %s5554_s30 }
 0xb94   : > { %s6499_s24 = smov %s5543_s27  ;;  %24 = sbr.rel (!%p22_p3) target bundleno = 6 (0x6), region = 131 }
 0xb9b   :  { %3783 = vsyncpa [#allocation3], 1 }
 0xb9c   :  { %3785 = vsyncpa [#allocation3 + $0x1], 1 }

</bundles_post_ra>
